<compile_context>
chip_gen: v7x
topology: tpu7x:2x2x1
jax: 0.10.0
libtpu: 0.0.40
codegen_flags: <defaults>
</compile_context>

<pallas_src>
import math
import jax
import jax.numpy as jnp
from jax.experimental import pallas as pl
from jax.experimental.pallas import tpu as pltpu

# ----------------------------- config (small) -----------------------------
VOCAB = 64
MAX_POS = 16
HIDDEN = 32          # DistilBERT "dim"
N_HEADS = 4
HEAD_DIM = HIDDEN // N_HEADS
FFN = 64             # DistilBERT "hidden_dim"
N_LAYERS = 2
LN_EPS = 1e-12
BATCH = 2
SEQ = 8


# ------------------------------ kernel utils ------------------------------
def _layernorm(x, gamma, beta):
    mu = jnp.mean(x, axis=-1, keepdims=True)
    var = jnp.mean((x - mu) ** 2, axis=-1, keepdims=True)
    return (x - mu) * jax.lax.rsqrt(var + LN_EPS) * gamma + beta


def _gelu(x):
    # exact (erf-based) GELU, matching HF DistilBERT's default activation
    return 0.5 * x * (1.0 + jax.lax.erf(x * 0.7071067811865476))


# ------------------------- fused forward kernel ---------------------------
def _make_fused_kernel(B, S):
    H, NH, HD = HIDDEN, N_HEADS, HEAD_DIM
    scale = 1.0 / math.sqrt(HD)

    def kernel(x_ref, maskb_ref, qkvw_ref, qkvb_ref, ow_ref,
               w1_ref, b1_ref, w2_ref, lnp_ref, outb_ref, embln_ref,
               o_ref, h_ref):
        layer = pl.program_id(0)

        # ---- embedding LayerNorm, only on the first grid step ----
        @pl.when(layer == 0)
        def _():
            h_ref[...] = _layernorm(x_ref[...],
                                    embln_ref[0:1, :], embln_ref[1:2, :])

        x = h_ref[...]                      # (B*S, H) resident activation
        maskb = maskb_ref[...]              # (B, S) additive mask bias (0 / -1e9)

        qkvw = qkvw_ref[0]                  # (3*NH, HD, H)  per-head fused QKV
        qkvb = qkvb_ref[0]                  # (3*NH, 1, HD)
        ow = ow_ref[0]                      # (NH, HD, H)    per-head out-proj
        lnp = lnp_ref[0]                    # (4, H): ln1_g, ln1_b, ln2_g, ln2_b
        outb = outb_ref[0]                  # (2, H): attn-out bias, ffn-out bias

        # ---- multi-head self-attention (head-batched, per batch element) ----
        attn_rows = []
        for b in range(B):                  # B=2, unrolled; keys can't mix batches
            xb = x[b * S:(b + 1) * S, :]                        # (S, H)
            xb_bc = jnp.broadcast_to(xb, (3 * NH, S, H))
            qkv = jnp.einsum('nsh,ndh->nsd', xb_bc, qkvw,
                             preferred_element_type=jnp.float32) + qkvb  # (3NH,S,HD)
            q = qkv[:NH] * scale                                # (NH, S, HD)
            k = qkv[NH:2 * NH]
            v = qkv[2 * NH:]
            s = jnp.einsum('nqd,nkd->nqk', q, k,
                           preferred_element_type=jnp.float32)  # (NH, S, S)
            s = s + maskb[b:b + 1, :]       # broadcast over heads & query rows
            s = s - jnp.max(s, axis=-1, keepdims=True)
            p = jnp.exp(s)
            p = p * pl.reciprocal(jnp.sum(p, axis=-1, keepdims=True), approx=True)
            ctx = jnp.einsum('nqk,nkd->nqd', p, v,
                             preferred_element_type=jnp.float32)  # (NH, S, HD)
            # per-head output projection; summing over heads == concat + Linear
            ab = jnp.einsum('nqd,ndh->nqh', ctx, ow,
                            preferred_element_type=jnp.float32)   # (NH, S, H)
            attn_rows.append(jnp.sum(ab, axis=0))                 # (S, H)
        attn = jnp.concatenate(attn_rows, axis=0) + outb[0:1, :]  # (B*S, H)

        # ---- residual + LayerNorm (post-LN, DistilBERT style) ----
        h1 = _layernorm(x + attn, lnp[0:1, :], lnp[1:2, :])

        # ---- FFN ----
        ff = _gelu(jnp.dot(h1, w1_ref[0], preferred_element_type=jnp.float32)
                   + b1_ref[0])
        ff = jnp.dot(ff, w2_ref[0], preferred_element_type=jnp.float32) + outb[1:2, :]
        h2 = _layernorm(h1 + ff, lnp[2:3, :], lnp[3:4, :])

        h_ref[...] = h2                    # carry activation to next layer
        o_ref[...] = h2                    # output block is resident; final
                                           # writeback happens after last step

    return kernel


# ------------------------------ param init ------------------------------
def init_params(key):
    std = 0.02
    keys = iter(jax.random.split(key, 2 + 4 * N_LAYERS))

    def nrm(shape):
        return (std * jax.random.normal(next(keys), shape)).astype(jnp.float32)

    qkvw, qkvb, ow, w1, b1, w2, lnp, outb = [], [], [], [], [], [], [], []
    ones_h = jnp.ones((1, HIDDEN), jnp.float32)
    zeros_h = jnp.zeros((1, HIDDEN), jnp.float32)
    for _ in range(N_LAYERS):
        qkvw.append(nrm((3 * N_HEADS, HEAD_DIM, HIDDEN)))          # per-head [d, in]
        qkvb.append(jnp.zeros((3 * N_HEADS, 1, HEAD_DIM), jnp.float32))
        ow.append(nrm((N_HEADS, HEAD_DIM, HIDDEN)))                # per-head [d, out]
        w1.append(nrm((HIDDEN, FFN)))
        b1.append(jnp.zeros((1, FFN), jnp.float32))
        w2.append(nrm((FFN, HIDDEN)))
        lnp.append(jnp.concatenate([ones_h, zeros_h, ones_h, zeros_h], axis=0))
        outb.append(jnp.zeros((2, HIDDEN), jnp.float32))

    return {
        "word_emb": nrm((VOCAB, HIDDEN)),
        "pos_emb": nrm((MAX_POS, HIDDEN)),
        "emb_ln": jnp.concatenate([ones_h, zeros_h], axis=0),      # (2, H)
        "qkvw": jnp.stack(qkvw), "qkvb": jnp.stack(qkvb), "ow": jnp.stack(ow),
        "w1": jnp.stack(w1), "b1": jnp.stack(b1), "w2": jnp.stack(w2),
        "lnp": jnp.stack(lnp), "outb": jnp.stack(outb),
    }


# ------------------------------ full forward ------------------------------
def distilbert_forward(params, words, attn_mask):
    B, S = words.shape
    # embeddings (gather = plain-JAX glue); everything else runs in ONE kernel
    pos = jnp.arange(S, dtype=jnp.int32)
    emb = params["word_emb"][words] + params["pos_emb"][pos][None, :, :]  # (B,S,H)
    x2d = emb.reshape(B * S, HIDDEN).astype(jnp.float32)
    # additive mask bias: 0.0 for real tokens, -1e9 for padding
    mask_bias = (attn_mask.astype(jnp.float32) - 1.0) * 1e9                # (B,S)

    def full(shp):
        return pl.BlockSpec(shp, lambda l, n=len(shp): (0,) * n)

    def per_layer(shp):
        return pl.BlockSpec((1,) + shp, lambda l, n=len(shp): (l,) + (0,) * n)

    out = pl.pallas_call(
        _make_fused_kernel(B, S),
        out_shape=jax.ShapeDtypeStruct((B * S, HIDDEN), jnp.float32),
        grid=(N_LAYERS,),
        in_specs=[
            full((B * S, HIDDEN)),                          # embeddings (post-gather)
            full((B, S)),                                   # additive mask bias
            per_layer((3 * N_HEADS, HEAD_DIM, HIDDEN)),     # fused per-head QKV weight
            per_layer((3 * N_HEADS, 1, HEAD_DIM)),          # fused per-head QKV bias
            per_layer((N_HEADS, HEAD_DIM, HIDDEN)),         # per-head out-proj weight
            per_layer((HIDDEN, FFN)),                       # FFN lin1 weight
            per_layer((1, FFN)),                            # FFN lin1 bias
            per_layer((FFN, HIDDEN)),                       # FFN lin2 weight
            per_layer((4, HIDDEN)),                         # ln1 g/b, ln2 g/b (packed)
            per_layer((2, HIDDEN)),                         # attn-out bias, FFN-out bias
            full((2, HIDDEN)),                              # embedding LN g/b (packed)
        ],
        out_specs=pl.BlockSpec((B * S, HIDDEN), lambda l: (0, 0)),
        scratch_shapes=[pltpu.VMEM((B * S, HIDDEN), jnp.float32)],
        compiler_params=pltpu.CompilerParams(
            dimension_semantics=("arbitrary",)),            # layers are sequential
    )(x2d, mask_bias,
      params["qkvw"], params["qkvb"], params["ow"],
      params["w1"], params["b1"], params["w2"],
      params["lnp"], params["outb"], params["emb_ln"])

    # returns last_hidden_state, matching DistilBertModel(words, attention_mask)[0]
    return out.reshape(B, S, HIDDEN)


# ---------------------------------- main ----------------------------------
if __name__ == "__main__":
    key = jax.random.PRNGKey(0)
    k_param, k_words = jax.random.split(key)

    params = init_params(k_param)
    words = jax.random.randint(k_words, (BATCH, SEQ), 0, VOCAB, dtype=jnp.int32)
    attn_mask = jnp.ones((BATCH, SEQ), jnp.float32)
    attn_mask = attn_mask.at[1, -2:].set(0.0)   # pad last two tokens of row 1

    out = distilbert_forward(params, words, attn_mask)
    jax.block_until_ready(out)
    assert out.shape == (BATCH, SEQ, HIDDEN)
    print("KERNEL_OK")
</pallas_src>

<mosaic_0001>
module attributes {stable_mosaic.version = 11 : i64} {
  func.func @kernel(%arg0: i32, %arg1: memref<16x32xf32, #tpu.memory_space<vmem>>, %arg2: memref<2x8xf32, #tpu.memory_space<vmem>>, %arg3: memref<1x12x8x32xf32, #tpu.memory_space<vmem>>, %arg4: memref<1x12x1x8xf32, #tpu.memory_space<vmem>>, %arg5: memref<1x4x8x32xf32, #tpu.memory_space<vmem>>, %arg6: memref<1x32x64xf32, #tpu.memory_space<vmem>>, %arg7: memref<1x1x64xf32, #tpu.memory_space<vmem>>, %arg8: memref<1x64x32xf32, #tpu.memory_space<vmem>>, %arg9: memref<1x4x32xf32, #tpu.memory_space<vmem>>, %arg10: memref<1x2x32xf32, #tpu.memory_space<vmem>>, %arg11: memref<2x32xf32, #tpu.memory_space<vmem>>, %arg12: memref<16x32xf32, #tpu.memory_space<vmem>>, %arg13: memref<16x32xf32, #tpu.memory_space<vmem>>) attributes {dimension_semantics = [#tpu.dimension_semantics<arbitrary>], iteration_bounds = array<i64: 2>, scalar_prefetch = 0 : i64, scratch_operands = 1 : i64, tpu.core_type = #tpu.core_type<tc>, window_params = [{pipeline_mode = #tpu.pipeline_mode<synchronous>, transform_indices = @transform_0, window_bounds = array<i64: 16, 32>}, {pipeline_mode = #tpu.pipeline_mode<synchronous>, transform_indices = @transform_1, window_bounds = array<i64: 2, 8>}, {transform_indices = @transform_2, window_bounds = array<i64: 1, 12, 8, 32>}, {transform_indices = @transform_3, window_bounds = array<i64: 1, 12, 1, 8>}, {transform_indices = @transform_4, window_bounds = array<i64: 1, 4, 8, 32>}, {transform_indices = @transform_5, window_bounds = array<i64: 1, 32, 64>}, {transform_indices = @transform_6, window_bounds = array<i64: 1, 1, 64>}, {transform_indices = @transform_7, window_bounds = array<i64: 1, 64, 32>}, {transform_indices = @transform_8, window_bounds = array<i64: 1, 4, 32>}, {transform_indices = @transform_9, window_bounds = array<i64: 1, 2, 32>}, {pipeline_mode = #tpu.pipeline_mode<synchronous>, transform_indices = @transform_10, window_bounds = array<i64: 2, 32>}, {pipeline_mode = #tpu.pipeline_mode<synchronous>, transform_indices = @transform_11, window_bounds = array<i64: 16, 32>}]} {
    %c0_i32 = arith.constant 0 : i32
    %0 = arith.cmpi eq, %arg0, %c0_i32 : i32
    %1 = arith.extui %0 : i1 to i32
    %c0_i32_0 = arith.constant 0 : i32
    %2 = arith.cmpi ne, %1, %c0_i32_0 : i32
    scf.if %2 {
      %c0_65 = arith.constant 0 : index
      %c0_66 = arith.constant 0 : index
      %150 = vector.load %arg1[%c0_65, %c0_66] : memref<16x32xf32, #tpu.memory_space<vmem>>, vector<16x32xf32>
      %c0_67 = arith.constant 0 : index
      %c0_68 = arith.constant 0 : index
      %151 = vector.load %arg11[%c0_67, %c0_68] : memref<2x32xf32, #tpu.memory_space<vmem>>, vector<1x32xf32>
      %c1 = arith.constant 1 : index
      %c0_69 = arith.constant 0 : index
      %152 = vector.load %arg11[%c1, %c0_69] : memref<2x32xf32, #tpu.memory_space<vmem>>, vector<1x32xf32>
      %cst_70 = arith.constant dense<0.000000e+00> : vector<16xf32>
      %153 = vector.multi_reduction <add>, %150, %cst_70 [1] : vector<16x32xf32> to vector<16xf32>
      %154 = vector.shape_cast %153 : vector<16xf32> to vector<16x1xf32>
      %cst_71 = arith.constant 3.200000e+01 : f32
      %155 = vector.broadcast %cst_71 : f32 to vector<16x1xf32>
      %156 = arith.divf %154, %155 : vector<16x1xf32>
      %157 = vector.broadcast %156 : vector<16x1xf32> to vector<16x32xf32>
      %158 = arith.subf %150, %157 : vector<16x32xf32>
      %159 = arith.mulf %158, %158 : vector<16x32xf32>
      %cst_72 = arith.constant dense<0.000000e+00> : vector<16xf32>
      %160 = vector.multi_reduction <add>, %159, %cst_72 [1] : vector<16x32xf32> to vector<16xf32>
      %161 = vector.shape_cast %160 : vector<16xf32> to vector<16x1xf32>
      %cst_73 = arith.constant 3.200000e+01 : f32
      %162 = vector.broadcast %cst_73 : f32 to vector<16x1xf32>
      %163 = arith.divf %161, %162 : vector<16x1xf32>
      %164 = vector.broadcast %156 : vector<16x1xf32> to vector<16x32xf32>
      %165 = arith.subf %150, %164 : vector<16x32xf32>
      %cst_74 = arith.constant 9.99999996E-13 : f32
      %166 = vector.broadcast %cst_74 : f32 to vector<16x1xf32>
      %167 = arith.addf %163, %166 : vector<16x1xf32>
      %168 = math.rsqrt %167 : vector<16x1xf32>
      %169 = vector.broadcast %168 : vector<16x1xf32> to vector<16x32xf32>
      %170 = arith.mulf %165, %169 : vector<16x32xf32>
      %171 = vector.broadcast %151 : vector<1x32xf32> to vector<16x32xf32>
      %172 = arith.mulf %170, %171 : vector<16x32xf32>
      %173 = vector.broadcast %152 : vector<1x32xf32> to vector<16x32xf32>
      %174 = arith.addf %172, %173 : vector<16x32xf32>
      %c0_75 = arith.constant 0 : index
      %c0_76 = arith.constant 0 : index
      %175 = vector.load %arg13[%c0_75, %c0_76] : memref<16x32xf32, #tpu.memory_space<vmem>>, vector<16x32xf32>
      tpu.vector_store %arg13[%c0_75, %c0_76], %174 {strides = array<i32>} : memref<16x32xf32, #tpu.memory_space<vmem>>, vector<16x32xf32>,
    } else {
    }
    %c0 = arith.constant 0 : index
    %c0_1 = arith.constant 0 : index
    %3 = vector.load %arg13[%c0, %c0_1] : memref<16x32xf32, #tpu.memory_space<vmem>>, vector<16x32xf32>
    %c0_2 = arith.constant 0 : index
    %c0_3 = arith.constant 0 : index
    %4 = vector.load %arg2[%c0_2, %c0_3] : memref<2x8xf32, #tpu.memory_space<vmem>>, vector<2x8xf32>
    %c0_4 = arith.constant 0 : index
    %c0_5 = arith.constant 0 : index
    %c0_6 = arith.constant 0 : index
    %c0_7 = arith.constant 0 : index
    %5 = vector.load %arg3[%c0_4, %c0_5, %c0_6, %c0_7] : memref<1x12x8x32xf32, #tpu.memory_space<vmem>>, vector<1x12x8x32xf32>
    %6 = vector.shape_cast %5 : vector<1x12x8x32xf32> to vector<12x8x32xf32>
    %c0_8 = arith.constant 0 : index
    %c0_9 = arith.constant 0 : index
    %c0_10 = arith.constant 0 : index
    %c0_11 = arith.constant 0 : index
    %7 = vector.load %arg4[%c0_8, %c0_9, %c0_10, %c0_11] : memref<1x12x1x8xf32, #tpu.memory_space<vmem>>, vector<1x12x1x8xf32>
    %8 = vector.shape_cast %7 : vector<1x12x1x8xf32> to vector<12x1x8xf32>
    %c0_12 = arith.constant 0 : index
    %c0_13 = arith.constant 0 : index
    %c0_14 = arith.constant 0 : index
    %c0_15 = arith.constant 0 : index
    %9 = vector.load %arg5[%c0_12, %c0_13, %c0_14, %c0_15] : memref<1x4x8x32xf32, #tpu.memory_space<vmem>>, vector<1x4x8x32xf32>
    %10 = vector.shape_cast %9 : vector<1x4x8x32xf32> to vector<4x8x32xf32>
    %c0_16 = arith.constant 0 : index
    %c0_17 = arith.constant 0 : index
    %c0_18 = arith.constant 0 : index
    %11 = vector.load %arg9[%c0_16, %c0_17, %c0_18] : memref<1x4x32xf32, #tpu.memory_space<vmem>>, vector<1x4x32xf32>
    %12 = vector.shape_cast %11 : vector<1x4x32xf32> to vector<4x32xf32>
    %c0_19 = arith.constant 0 : index
    %c0_20 = arith.constant 0 : index
    %c0_21 = arith.constant 0 : index
    %13 = vector.load %arg10[%c0_19, %c0_20, %c0_21] : memref<1x2x32xf32, #tpu.memory_space<vmem>>, vector<1x2x32xf32>
    %14 = vector.shape_cast %13 : vector<1x2x32xf32> to vector<2x32xf32>
    %15 = vector.extract_strided_slice %3 {offsets = [0, 0], sizes = [8, 32], strides = [1, 1]} : vector<16x32xf32> to vector<8x32xf32>
    %16 = vector.shape_cast %15 : vector<8x32xf32> to vector<1x8x32xf32>
    %17 = vector.broadcast %16 : vector<1x8x32xf32> to vector<12x8x32xf32>
    "tpu.trace_start"() <{level = 10 : i32, message = "nsh,ndh->nsd"}> : () -> ()
    %cst = arith.constant dense<0.000000e+00> : vector<12x8x8xf32>
    %18 = tpu.matmul %17, %6, %cst {dimension_numbers = #tpu.dot_dimension_numbers<[2], [2], [1], [1], [0, 0, 0, 1, 1, 1], [0], [0]>} : vector<12x8x32xf32>, vector<12x8x32xf32>, vector<12x8x8xf32> -> vector<12x8x8xf32>
    "tpu.trace_stop"() : () -> ()
    %19 = vector.broadcast %8 : vector<12x1x8xf32> to vector<12x8x8xf32>
    %20 = arith.addf %18, %19 : vector<12x8x8xf32>
    %21 = vector.extract_strided_slice %20 {offsets = [0, 0, 0], sizes = [4, 8, 8], strides = [1, 1, 1]} : vector<12x8x8xf32> to vector<4x8x8xf32>
    %cst_22 = arith.constant 0.353553385 : f32
    %22 = vector.broadcast %cst_22 : f32 to vector<4x8x8xf32>
    %23 = arith.mulf %21, %22 : vector<4x8x8xf32>
    %24 = vector.extract_strided_slice %20 {offsets = [4, 0, 0], sizes = [4, 8, 8], strides = [1, 1, 1]} : vector<12x8x8xf32> to vector<4x8x8xf32>
    %25 = vector.extract_strided_slice %20 {offsets = [8, 0, 0], sizes = [4, 8, 8], strides = [1, 1, 1]} : vector<12x8x8xf32> to vector<4x8x8xf32>
    "tpu.trace_start"() <{level = 10 : i32, message = "nqd,nkd->nqk"}> : () -> ()
    %cst_23 = arith.constant dense<0.000000e+00> : vector<4x8x8xf32>
    %26 = tpu.matmul %23, %24, %cst_23 {dimension_numbers = #tpu.dot_dimension_numbers<[2], [2], [1], [1], [0, 0, 0, 1, 1, 1], [0], [0]>} : vector<4x8x8xf32>, vector<4x8x8xf32>, vector<4x8x8xf32> -> vector<4x8x8xf32>
    "tpu.trace_stop"() : () -> ()
    %27 = vector.extract_strided_slice %4 {offsets = [0, 0], sizes = [1, 8], strides = [1, 1]} : vector<2x8xf32> to vector<1x8xf32>
    %28 = vector.shape_cast %27 : vector<1x8xf32> to vector<1x1x8xf32>
    %29 = vector.broadcast %28 : vector<1x1x8xf32> to vector<4x8x8xf32>
    %30 = arith.addf %26, %29 : vector<4x8x8xf32>
    %cst_24 = arith.constant dense<0xFF800000> : vector<4x8xf32>
    %31 = vector.multi_reduction <maximumf>, %30, %cst_24 [2] : vector<4x8x8xf32> to vector<4x8xf32>
    %32 = vector.shape_cast %31 : vector<4x8xf32> to vector<4x8x1xf32>
    %33 = vector.broadcast %32 : vector<4x8x1xf32> to vector<4x8x8xf32>
    %34 = arith.subf %30, %33 : vector<4x8x8xf32>
    %35 = math.exp %34 : vector<4x8x8xf32>
    %cst_25 = arith.constant dense<0.000000e+00> : vector<4x8xf32>
    %36 = vector.multi_reduction <add>, %35, %cst_25 [2] : vector<4x8x8xf32> to vector<4x8xf32>
    %37 = vector.shape_cast %36 : vector<4x8xf32> to vector<4x8x1xf32>
    %38 = tpu.reciprocal %37 {approx = true} : vector<4x8x1xf32> -> vector<4x8x1xf32>
    %39 = vector.broadcast %38 : vector<4x8x1xf32> to vector<4x8x8xf32>
    %40 = arith.mulf %35, %39 : vector<4x8x8xf32>
    "tpu.trace_start"() <{level = 10 : i32, message = "nqk,nkd->nqd"}> : () -> ()
    %cst_26 = arith.constant dense<0.000000e+00> : vector<4x8x8xf32>
    %41 = tpu.matmul %40, %25, %cst_26 {dimension_numbers = #tpu.dot_dimension_numbers<[2], [1], [1], [2], [0, 0, 0, 1, 1, 2], [0], [0]>} : vector<4x8x8xf32>, vector<4x8x8xf32>, vector<4x8x8xf32> -> vector<4x8x8xf32>
    "tpu.trace_stop"() : () -> ()
    "tpu.trace_start"() <{level = 10 : i32, message = "nqd,ndh->nqh"}> : () -> ()
    %cst_27 = arith.constant dense<0.000000e+00> : vector<4x8x32xf32>
    %42 = tpu.matmul %41, %10, %cst_27 {dimension_numbers = #tpu.dot_dimension_numbers<[2], [1], [1], [2], [0, 0, 0, 1, 1, 2], [0], [0]>} : vector<4x8x8xf32>, vector<4x8x32xf32>, vector<4x8x32xf32> -> vector<4x8x32xf32>
    "tpu.trace_stop"() : () -> ()
    %cst_28 = arith.constant dense<0.000000e+00> : vector<8x32xf32>
    %43 = vector.multi_reduction <add>, %42, %cst_28 [0] : vector<4x8x32xf32> to vector<8x32xf32>
    %44 = vector.extract_strided_slice %3 {offsets = [8, 0], sizes = [8, 32], strides = [1, 1]} : vector<16x32xf32> to vector<8x32xf32>
    %45 = vector.shape_cast %44 : vector<8x32xf32> to vector<1x8x32xf32>
    %46 = vector.broadcast %45 : vector<1x8x32xf32> to vector<12x8x32xf32>
    "tpu.trace_start"() <{level = 10 : i32, message = "nsh,ndh->nsd"}> : () -> ()
    %cst_29 = arith.constant dense<0.000000e+00> : vector<12x8x8xf32>
    %47 = tpu.matmul %46, %6, %cst_29 {dimension_numbers = #tpu.dot_dimension_numbers<[2], [2], [1], [1], [0, 0, 0, 1, 1, 1], [0], [0]>} : vector<12x8x32xf32>, vector<12x8x32xf32>, vector<12x8x8xf32> -> vector<12x8x8xf32>
    "tpu.trace_stop"() : () -> ()
    %48 = vector.broadcast %8 : vector<12x1x8xf32> to vector<12x8x8xf32>
    %49 = arith.addf %47, %48 : vector<12x8x8xf32>
    %50 = vector.extract_strided_slice %49 {offsets = [0, 0, 0], sizes = [4, 8, 8], strides = [1, 1, 1]} : vector<12x8x8xf32> to vector<4x8x8xf32>
    %cst_30 = arith.constant 0.353553385 : f32
    %51 = vector.broadcast %cst_30 : f32 to vector<4x8x8xf32>
    %52 = arith.mulf %50, %51 : vector<4x8x8xf32>
    %53 = vector.extract_strided_slice %49 {offsets = [4, 0, 0], sizes = [4, 8, 8], strides = [1, 1, 1]} : vector<12x8x8xf32> to vector<4x8x8xf32>
    %54 = vector.extract_strided_slice %49 {offsets = [8, 0, 0], sizes = [4, 8, 8], strides = [1, 1, 1]} : vector<12x8x8xf32> to vector<4x8x8xf32>
    "tpu.trace_start"() <{level = 10 : i32, message = "nqd,nkd->nqk"}> : () -> ()
    %cst_31 = arith.constant dense<0.000000e+00> : vector<4x8x8xf32>
    %55 = tpu.matmul %52, %53, %cst_31 {dimension_numbers = #tpu.dot_dimension_numbers<[2], [2], [1], [1], [0, 0, 0, 1, 1, 1], [0], [0]>} : vector<4x8x8xf32>, vector<4x8x8xf32>, vector<4x8x8xf32> -> vector<4x8x8xf32>
    "tpu.trace_stop"() : () -> ()
    %56 = vector.extract_strided_slice %4 {offsets = [1, 0], sizes = [1, 8], strides = [1, 1]} : vector<2x8xf32> to vector<1x8xf32>
    %57 = vector.shape_cast %56 : vector<1x8xf32> to vector<1x1x8xf32>
    %58 = vector.broadcast %57 : vector<1x1x8xf32> to vector<4x8x8xf32>
    %59 = arith.addf %55, %58 : vector<4x8x8xf32>
    %cst_32 = arith.constant dense<0xFF800000> : vector<4x8xf32>
    %60 = vector.multi_reduction <maximumf>, %59, %cst_32 [2] : vector<4x8x8xf32> to vector<4x8xf32>
    %61 = vector.shape_cast %60 : vector<4x8xf32> to vector<4x8x1xf32>
    %62 = vector.broadcast %61 : vector<4x8x1xf32> to vector<4x8x8xf32>
    %63 = arith.subf %59, %62 : vector<4x8x8xf32>
    %64 = math.exp %63 : vector<4x8x8xf32>
    %cst_33 = arith.constant dense<0.000000e+00> : vector<4x8xf32>
    %65 = vector.multi_reduction <add>, %64, %cst_33 [2] : vector<4x8x8xf32> to vector<4x8xf32>
    %66 = vector.shape_cast %65 : vector<4x8xf32> to vector<4x8x1xf32>
    %67 = tpu.reciprocal %66 {approx = true} : vector<4x8x1xf32> -> vector<4x8x1xf32>
    %68 = vector.broadcast %67 : vector<4x8x1xf32> to vector<4x8x8xf32>
    %69 = arith.mulf %64, %68 : vector<4x8x8xf32>
    "tpu.trace_start"() <{level = 10 : i32, message = "nqk,nkd->nqd"}> : () -> ()
    %cst_34 = arith.constant dense<0.000000e+00> : vector<4x8x8xf32>
    %70 = tpu.matmul %69, %54, %cst_34 {dimension_numbers = #tpu.dot_dimension_numbers<[2], [1], [1], [2], [0, 0, 0, 1, 1, 2], [0], [0]>} : vector<4x8x8xf32>, vector<4x8x8xf32>, vector<4x8x8xf32> -> vector<4x8x8xf32>
    "tpu.trace_stop"() : () -> ()
    "tpu.trace_start"() <{level = 10 : i32, message = "nqd,ndh->nqh"}> : () -> ()
    %cst_35 = arith.constant dense<0.000000e+00> : vector<4x8x32xf32>
    %71 = tpu.matmul %70, %10, %cst_35 {dimension_numbers = #tpu.dot_dimension_numbers<[2], [1], [1], [2], [0, 0, 0, 1, 1, 2], [0], [0]>} : vector<4x8x8xf32>, vector<4x8x32xf32>, vector<4x8x32xf32> -> vector<4x8x32xf32>
    "tpu.trace_stop"() : () -> ()
    %cst_36 = arith.constant dense<0.000000e+00> : vector<8x32xf32>
    %72 = vector.multi_reduction <add>, %71, %cst_36 [0] : vector<4x8x32xf32> to vector<8x32xf32>
    %73 = tpu.concatenate %43, %72 in 0 : vector<8x32xf32>, vector<8x32xf32> -> vector<16x32xf32>
    %74 = vector.extract_strided_slice %14 {offsets = [0, 0], sizes = [1, 32], strides = [1, 1]} : vector<2x32xf32> to vector<1x32xf32>
    %75 = vector.broadcast %74 : vector<1x32xf32> to vector<16x32xf32>
    %76 = arith.addf %73, %75 : vector<16x32xf32>
    %77 = arith.addf %3, %76 : vector<16x32xf32>
    %78 = vector.extract_strided_slice %12 {offsets = [0, 0], sizes = [1, 32], strides = [1, 1]} : vector<4x32xf32> to vector<1x32xf32>
    %79 = vector.extract_strided_slice %12 {offsets = [1, 0], sizes = [1, 32], strides = [1, 1]} : vector<4x32xf32> to vector<1x32xf32>
    %cst_37 = arith.constant dense<0.000000e+00> : vector<16xf32>
    %80 = vector.multi_reduction <add>, %77, %cst_37 [1] : vector<16x32xf32> to vector<16xf32>
    %81 = vector.shape_cast %80 : vector<16xf32> to vector<16x1xf32>
    %cst_38 = arith.constant 3.200000e+01 : f32
    %82 = vector.broadcast %cst_38 : f32 to vector<16x1xf32>
    %83 = arith.divf %81, %82 : vector<16x1xf32>
    %84 = vector.broadcast %83 : vector<16x1xf32> to vector<16x32xf32>
    %85 = arith.subf %77, %84 : vector<16x32xf32>
    %86 = arith.mulf %85, %85 : vector<16x32xf32>
    %cst_39 = arith.constant dense<0.000000e+00> : vector<16xf32>
    %87 = vector.multi_reduction <add>, %86, %cst_39 [1] : vector<16x32xf32> to vector<16xf32>
    %88 = vector.shape_cast %87 : vector<16xf32> to vector<16x1xf32>
    %cst_40 = arith.constant 3.200000e+01 : f32
    %89 = vector.broadcast %cst_40 : f32 to vector<16x1xf32>
    %90 = arith.divf %88, %89 : vector<16x1xf32>
    %91 = vector.broadcast %83 : vector<16x1xf32> to vector<16x32xf32>
    %92 = arith.subf %77, %91 : vector<16x32xf32>
    %cst_41 = arith.constant 9.99999996E-13 : f32
    %93 = vector.broadcast %cst_41 : f32 to vector<16x1xf32>
    %94 = arith.addf %90, %93 : vector<16x1xf32>
    %95 = math.rsqrt %94 : vector<16x1xf32>
    %96 = vector.broadcast %95 : vector<16x1xf32> to vector<16x32xf32>
    %97 = arith.mulf %92, %96 : vector<16x32xf32>
    %98 = vector.broadcast %78 : vector<1x32xf32> to vector<16x32xf32>
    %99 = arith.mulf %97, %98 : vector<16x32xf32>
    %100 = vector.broadcast %79 : vector<1x32xf32> to vector<16x32xf32>
    %101 = arith.addf %99, %100 : vector<16x32xf32>
    %c0_42 = arith.constant 0 : index
    %c0_43 = arith.constant 0 : index
    %c0_44 = arith.constant 0 : index
    %102 = vector.load %arg6[%c0_42, %c0_43, %c0_44] : memref<1x32x64xf32, #tpu.memory_space<vmem>>, vector<1x32x64xf32>
    %103 = vector.shape_cast %102 : vector<1x32x64xf32> to vector<32x64xf32>
    %cst_45 = arith.constant dense<0.000000e+00> : vector<16x64xf32>
    %104 = tpu.matmul %101, %103, %cst_45 {dimension_numbers = #tpu.dot_dimension_numbers<[1], [0], [0], [1], [0, 0, 1, 1], [], []>} : vector<16x32xf32>, vector<32x64xf32>, vector<16x64xf32> -> vector<16x64xf32>
    %c0_46 = arith.constant 0 : index
    %c0_47 = arith.constant 0 : index
    %c0_48 = arith.constant 0 : index
    %105 = vector.load %arg7[%c0_46, %c0_47, %c0_48] : memref<1x1x64xf32, #tpu.memory_space<vmem>>, vector<1x1x64xf32>
    %106 = vector.shape_cast %105 : vector<1x1x64xf32> to vector<1x64xf32>
    %107 = vector.broadcast %106 : vector<1x64xf32> to vector<16x64xf32>
    %108 = arith.addf %104, %107 : vector<16x64xf32>
    %cst_49 = arith.constant 5.000000e-01 : f32
    %109 = vector.broadcast %cst_49 : f32 to vector<16x64xf32>
    %110 = arith.mulf %109, %108 : vector<16x64xf32>
    %cst_50 = arith.constant 0.707106769 : f32
    %111 = vector.broadcast %cst_50 : f32 to vector<16x64xf32>
    %112 = arith.mulf %108, %111 : vector<16x64xf32>
    %113 = math.erf %112 : vector<16x64xf32>
    %cst_51 = arith.constant 1.000000e+00 : f32
    %114 = vector.broadcast %cst_51 : f32 to vector<16x64xf32>
    %115 = arith.addf %114, %113 : vector<16x64xf32>
    %116 = arith.mulf %110, %115 : vector<16x64xf32>
    %c0_52 = arith.constant 0 : index
    %c0_53 = arith.constant 0 : index
    %c0_54 = arith.constant 0 : index
    %117 = vector.load %arg8[%c0_52, %c0_53, %c0_54] : memref<1x64x32xf32, #tpu.memory_space<vmem>>, vector<1x64x32xf32>
    %118 = vector.shape_cast %117 : vector<1x64x32xf32> to vector<64x32xf32>
    %cst_55 = arith.constant dense<0.000000e+00> : vector<16x32xf32>
    %119 = tpu.matmul %116, %118, %cst_55 {dimension_numbers = #tpu.dot_dimension_numbers<[1], [0], [0], [1], [0, 0, 1, 1], [], []>} : vector<16x64xf32>, vector<64x32xf32>, vector<16x32xf32> -> vector<16x32xf32>
    %120 = vector.extract_strided_slice %14 {offsets = [1, 0], sizes = [1, 32], strides = [1, 1]} : vector<2x32xf32> to vector<1x32xf32>
    %121 = vector.broadcast %120 : vector<1x32xf32> to vector<16x32xf32>
    %122 = arith.addf %119, %121 : vector<16x32xf32>
    %123 = arith.addf %101, %122 : vector<16x32xf32>
    %124 = vector.extract_strided_slice %12 {offsets = [2, 0], sizes = [1, 32], strides = [1, 1]} : vector<4x32xf32> to vector<1x32xf32>
    %125 = vector.extract_strided_slice %12 {offsets = [3, 0], sizes = [1, 32], strides = [1, 1]} : vector<4x32xf32> to vector<1x32xf32>
    %cst_56 = arith.constant dense<0.000000e+00> : vector<16xf32>
    %126 = vector.multi_reduction <add>, %123, %cst_56 [1] : vector<16x32xf32> to vector<16xf32>
    %127 = vector.shape_cast %126 : vector<16xf32> to vector<16x1xf32>
    %cst_57 = arith.constant 3.200000e+01 : f32
    %128 = vector.broadcast %cst_57 : f32 to vector<16x1xf32>
    %129 = arith.divf %127, %128 : vector<16x1xf32>
    %130 = vector.broadcast %129 : vector<16x1xf32> to vector<16x32xf32>
    %131 = arith.subf %123, %130 : vector<16x32xf32>
    %132 = arith.mulf %131, %131 : vector<16x32xf32>
    %cst_58 = arith.constant dense<0.000000e+00> : vector<16xf32>
    %133 = vector.multi_reduction <add>, %132, %cst_58 [1] : vector<16x32xf32> to vector<16xf32>
    %134 = vector.shape_cast %133 : vector<16xf32> to vector<16x1xf32>
    %cst_59 = arith.constant 3.200000e+01 : f32
    %135 = vector.broadcast %cst_59 : f32 to vector<16x1xf32>
    %136 = arith.divf %134, %135 : vector<16x1xf32>
    %137 = vector.broadcast %129 : vector<16x1xf32> to vector<16x32xf32>
    %138 = arith.subf %123, %137 : vector<16x32xf32>
    %cst_60 = arith.constant 9.99999996E-13 : f32
    %139 = vector.broadcast %cst_60 : f32 to vector<16x1xf32>
    %140 = arith.addf %136, %139 : vector<16x1xf32>
    %141 = math.rsqrt %140 : vector<16x1xf32>
    %142 = vector.broadcast %141 : vector<16x1xf32> to vector<16x32xf32>
    %143 = arith.mulf %138, %142 : vector<16x32xf32>
    %144 = vector.broadcast %124 : vector<1x32xf32> to vector<16x32xf32>
    %145 = arith.mulf %143, %144 : vector<16x32xf32>
    %146 = vector.broadcast %125 : vector<1x32xf32> to vector<16x32xf32>
    %147 = arith.addf %145, %146 : vector<16x32xf32>
    %c0_61 = arith.constant 0 : index
    %c0_62 = arith.constant 0 : index
    %148 = vector.load %arg13[%c0_61, %c0_62] : memref<16x32xf32, #tpu.memory_space<vmem>>, vector<16x32xf32>
    tpu.vector_store %arg13[%c0_61, %c0_62], %147 {strides = array<i32>} : memref<16x32xf32, #tpu.memory_space<vmem>>, vector<16x32xf32>,
    %c0_63 = arith.constant 0 : index
    %c0_64 = arith.constant 0 : index
    %149 = vector.load %arg12[%c0_63, %c0_64] : memref<16x32xf32, #tpu.memory_space<vmem>>, vector<16x32xf32>
    tpu.vector_store %arg12[%c0_63, %c0_64], %147 {strides = array<i32>} : memref<16x32xf32, #tpu.memory_space<vmem>>, vector<16x32xf32>,
    return
  }
  func.func @transform_0(%arg0: i32) -> (i32, i32) {
    %c0_i32 = arith.constant 0 : i32
    %c0_i32_0 = arith.constant 0 : i32
    %c0_i32_1 = arith.constant 0 : i32
    return %c0_i32, %c0_i32_0 : i32, i32
  }
  func.func @transform_1(%arg0: i32) -> (i32, i32) {
    %c0_i32 = arith.constant 0 : i32
    %c0_i32_0 = arith.constant 0 : i32
    %c0_i32_1 = arith.constant 0 : i32
    return %c0_i32, %c0_i32_0 : i32, i32
  }
  func.func @transform_2(%arg0: i32) -> (i32, i32, i32, i32) {
    %c0_i32 = arith.constant 0 : i32
    %c0_i32_0 = arith.constant 0 : i32
    %c0_i32_1 = arith.constant 0 : i32
    %c0_i32_2 = arith.constant 0 : i32
    return %arg0, %c0_i32, %c0_i32_0, %c0_i32_1 : i32, i32, i32, i32
  }
  func.func @transform_3(%arg0: i32) -> (i32, i32, i32, i32) {
    %c0_i32 = arith.constant 0 : i32
    %c0_i32_0 = arith.constant 0 : i32
    %c0_i32_1 = arith.constant 0 : i32
    %c0_i32_2 = arith.constant 0 : i32
    return %arg0, %c0_i32, %c0_i32_0, %c0_i32_1 : i32, i32, i32, i32
  }
  func.func @transform_4(%arg0: i32) -> (i32, i32, i32, i32) {
    %c0_i32 = arith.constant 0 : i32
    %c0_i32_0 = arith.constant 0 : i32
    %c0_i32_1 = arith.constant 0 : i32
    %c0_i32_2 = arith.constant 0 : i32
    return %arg0, %c0_i32, %c0_i32_0, %c0_i32_1 : i32, i32, i32, i32
  }
  func.func @transform_5(%arg0: i32) -> (i32, i32, i32) {
    %c0_i32 = arith.constant 0 : i32
    %c0_i32_0 = arith.constant 0 : i32
    %c0_i32_1 = arith.constant 0 : i32
    return %arg0, %c0_i32, %c0_i32_0 : i32, i32, i32
  }
  func.func @transform_6(%arg0: i32) -> (i32, i32, i32) {
    %c0_i32 = arith.constant 0 : i32
    %c0_i32_0 = arith.constant 0 : i32
    %c0_i32_1 = arith.constant 0 : i32
    return %arg0, %c0_i32, %c0_i32_0 : i32, i32, i32
  }
  func.func @transform_7(%arg0: i32) -> (i32, i32, i32) {
    %c0_i32 = arith.constant 0 : i32
    %c0_i32_0 = arith.constant 0 : i32
    %c0_i32_1 = arith.constant 0 : i32
    return %arg0, %c0_i32, %c0_i32_0 : i32, i32, i32
  }
  func.func @transform_8(%arg0: i32) -> (i32, i32, i32) {
    %c0_i32 = arith.constant 0 : i32
    %c0_i32_0 = arith.constant 0 : i32
    %c0_i32_1 = arith.constant 0 : i32
    return %arg0, %c0_i32, %c0_i32_0 : i32, i32, i32
  }
  func.func @transform_9(%arg0: i32) -> (i32, i32, i32) {
    %c0_i32 = arith.constant 0 : i32
    %c0_i32_0 = arith.constant 0 : i32
    %c0_i32_1 = arith.constant 0 : i32
    return %arg0, %c0_i32, %c0_i32_0 : i32, i32, i32
  }
  func.func @transform_10(%arg0: i32) -> (i32, i32) {
    %c0_i32 = arith.constant 0 : i32
    %c0_i32_0 = arith.constant 0 : i32
    %c0_i32_1 = arith.constant 0 : i32
    return %c0_i32, %c0_i32_0 : i32, i32
  }
  func.func @transform_11(%arg0: i32) -> (i32, i32) {
    %c0_i32 = arith.constant 0 : i32
    %c0_i32_0 = arith.constant 0 : i32
    %c0_i32_1 = arith.constant 0 : i32
    return %c0_i32, %c0_i32_0 : i32, i32
  }
}

</mosaic_0001>

<bundles_post_ra>
// kernel: tpu_custom_call.1
= control target key start
LH: loop header
LB: loop body
LE: loop exit
PB: predicated region body
PF: predicated region fallthrough
CT: control target
= control target key end

     0   :  { %s6625_s0 = inlined_call_operand.hbm [shape: f32[16,32], index: 0, kind: input, shape index: {}]   ;;  %s6626_s1 = inlined_call_operand.vmem [shape: f32[2,8], index: 1, kind: input, shape index: {}]   ;;  %s6627_s2 = inlined_call_operand.vmem [shape: f32[2,12,8,32], index: 2, kind: input, shape index: {}]   ;;  %s6628_s3 = inlined_call_operand.vmem [shape: f32[2,12,1,8], index: 3, kind: input, shape index: {}]   ;;  %s6629_s4 = inlined_call_operand.hbm [shape: f32[2,4,8,32], index: 4, kind: input, shape index: {}]   ;;  %s6630_s5 = inlined_call_operand.hbm [shape: f32[2,32,64], index: 5, kind: input, shape index: {}]   ;;  %s6631_s6 = inlined_call_operand.hbm [shape: f32[2,1,64], index: 6, kind: input, shape index: {}]   ;;  %s6632_s7 = inlined_call_operand.vmem [shape: f32[2,64,32], index: 7, kind: input, shape index: {}]   ;;  %s6633_s8 = inlined_call_operand.hbm [shape: f32[2,4,32], index: 8, kind: input, shape index: {}]   ;;  %s6634_s9 = inlined_call_operand.vmem [shape: f32[2,2,32], index: 9, kind: input, shape index: {}]   ;;  %s6635_s10 = inlined_call_operand.vmem [shape: f32[2,32], index: 10, kind: input, shape index: {}]   ;;  %s6636_s11 = inlined_call_operand.hbm [shape: f32[16,32], index: 11, kind: output, shape index: {}]  }
   0x1   :  { %6655 = sst [smem:[#allocation20_spill]] %s6626_s1 }
   0x2   :  { %6656 = sst [smem:[#allocation21_spill]] %s6629_s4 }
   0x3   :  { %6657 = sst [smem:[#allocation22_spill]] %s6630_s5 }
   0x4   :  { %6658 = sst [smem:[#allocation23_spill]] %s6631_s6 }
   0x5   :  { %6659 = sst [smem:[#allocation24_spill]] %s6636_s11 }
   0x6   :  { %16 = vsyncpa [#allocation4], 0 }
   0x7   :  { %17 = vsyncpa [#allocation7], 0 }
   0x8   :  { %19 = vsyncpa [#allocation7 + $0x1], 0 }
   0x9   :  { %20 = vsyncpa [#allocation10], 0 }
   0xa   :  { %22 = vsyncpa [#allocation10 + $0x1], 0 }
   0xb   :  { %23 = vsyncpa [#allocation5], 0  ;;  %s5783_s17 = smov 0   ;;  %s5785_s18 = smov 0  }
   0xc   :  { %s5787_s19 = smov 0   ;;  %s5789_s20 = smov 0  }
   0xd LB: > { %6660 = sst [smem:[#allocation17_spill]] %s5705_s19  ;;  %s5804_s21 = sadd.s32 1, %s5709_s20   ;;  %s5709_s20 = sphi %s5789_s20, %s6689_s20   ;;  %s5705_s19 = sphi %s5787_s19, %s6691_s19   ;;  %s5701_s18 = sphi %s5785_s18, %s6693_s18   ;;  %s5697_s17 = sphi %s5783_s17, %s6692_s17  }
   0xe   : > { %6661 = sst [smem:[#allocation18_spill]] %s5804_s21  ;;  %s130_s22 = sadd.s32 1, %s5705_s19 }
   0xf   : > { %s127_s23 = ssub.s32 %s5709_s20, %s5804_s21  ;;  %p137_p0 = scmp.ne.s32.totalorder %s5705_s19, %s5701_s18 }
  0x10   : > { %p128_p1 = scmp.eq.s32.totalorder %s127_s23, 0  ;;  %p138_p2 = scmp.eq.s32.totalorder %s5709_s20, 0 }
  0x11   : > { %p5397_p4 = scmp.lt.s32.totalorder %s5709_s20, 2  ;;  %s6638_s25 = sand.u32 1, %s5709_s20  }
  0x12   : > { %s5813_s24 = scalar_select %p128_p1, %s5705_s19, %s130_s22  }
  0x13   : > { %p139_p3 = por %p138_p2, %p137_p0  ;;  %s5818_s26 = sand.u32 1, %s5705_s19  }
  0x14   : > { %6662 = sst [smem:[#allocation19_spill]] %s5813_s24  ;;  %s6637_s27 = sshll.u32 %s5818_s26, 5 }
  0x15   : > { %s4952_s28 = sshll.u32 %s5709_s20, 9  ;;  %s6663_s4 = sld [smem:[#allocation21_spill]] }
  0x16   : > { %s377_s13 = scalar_lea.vmem [#allocation6], %s6637_s27  ;;  %p5829_p5 = pnand %p5397_p4, %p139_p3 }
  0x17   : > { %s384_s14 = sshll.u32 %s377_s13, 4  ;;  %s6665_s5 = sld [smem:[#allocation22_spill]]  ;;  %s5833_s14 = int_to_ptr.vmem [resolvable:$true] %s384_s14 }
  0x18   : > { %s6664_s15 = scalar_select %p5829_p5, 1, 0 }
  0x19   : > { %s5842_s29 = scalar_lea.sflag [#allocation7], %s6638_s25  ;;  %p5848_p7 = pneg %p5829_p5 }
  0x1b   : > { %s5825_s12 = scalar_lea.hbm %s6663_s4, %s4952_s28  ;;  %s5494_s16 = scalar_lea.hbm %s6663_s4, 1024 }
  0x1c   : > { %s5489_s30 = scalar_lea.hbm %s5825_s12, 512  ;;  %p5495_p10 = scmp.lt.u32.totalorder %s5825_s12, %s6663_s4 }
  0x1d   : > { %s5838_s23 = scalar_lea.hbm %s6665_s5, %s4952_s28  ;;  %p5490_p6 = scmp.ne.s32.totalorder %s5825_s12, %s5489_s30 }
  0x1e   : > { %s6666_s13 = scalar_select %p5848_p7, 1, 0 }
  0x1f   : > { %p5492_p8 = pnand %p5848_p7, %p5490_p6  ;;  %p5496_p11 = scmp.lt.u32.totalorder %s5494_s16, %s5489_s30 }
  0x20   : > { %p5498_p13 = scmp.lt.u32.totalorder %s5489_s30, %s5825_s12 }
  0x21   : > { %p5493_p9 = pneg %p5492_p8  ;;  %p5497_p12 = por %p5496_p11, %p5495_p10 }
  0x23   : > { %p5499_p0 = por %p5498_p13, %p5497_p12 }
  0x25   : > { %p5500_p1 = pnand %p5499_p0, %p5493_p9 }
  0x27   : > { %5503 = shalt.err (!%p5500_p1)
}
  0x28   : > { %s5504_s25 = scalar_lea.vmem %s5833_s14, 512  ;;  %s5711_s24 = smov [#allocation6]  }
  0x29   : > { %p5505_p2 = scmp.ne.s32.totalorder %s5833_s14, %s5504_s25  ;;  %s5509_s27 = sshll.u32 %s5711_s24, 4  ;;  %s5510_s27 = int_to_ptr.vmem [resolvable:$false] %s5509_s27 }
  0x2a   : > { %s5511_s28 = scalar_lea.vmem %s5510_s27, 1024  ;;  %p5512_p6 = scmp.lt.s32.totalorder %s5833_s14, %s5510_s27 }
  0x2b   : > { %p5507_p3 = pnand %p5505_p2, %p5848_p7  ;;  %p5513_p8 = scmp.lt.s32.totalorder %s5511_s28, %s5504_s25 }
  0x2d   : > { %p5508_p4 = pneg %p5507_p3  ;;  %p5514_p10 = por %p5513_p8, %p5512_p6 }
  0x2f   : > { %p5515_p11 = pnand %p5514_p10, %p5508_p4 }
  0x31   : > { %5518 = shalt.err (!%p5515_p11)
}
  0x32   : > { %s6643_s30 = smov 128   ;;  %s6651_s16 = smov 8  }
  0x33   : > { %5386 = dma.hbm_to_vmem [thread:$0]  (!%p5829_p5), %s5825_s12, 512, %s5833_s14, %s5842_s29, %s6643_s30, %s6643_s30, %s6651_s16  }
  0x34   : > { %s6667_s25 = sshll.u32 %s5818_s26, 5  ;;  %s4836_s27 = sshll.u32 %s5709_s20, 4 }
  0x35   : > { %s398_s22 = scalar_lea.vmem [#allocation8], %s6667_s25  ;;  %s418_s28 = scalar_lea.vmem [#allocation9], %s5818_s26 }
  0x36   : > { %s405_s24 = sshll.u32 %s398_s22, 4  ;;  %s425_s4 = sshll.u32 %s418_s28, 4  ;;  %s5877_s24 = int_to_ptr.vmem [resolvable:$true] %s405_s24  ;;  %s426_s4 = int_to_ptr.vmem [resolvable:$true] %s425_s4 }
  0x37   : > { %s6668_s6 = sld [smem:[#allocation23_spill]]  ;;  %s6669_s1 = sand.u32 1, %s5709_s20  }
  0x38   : > { %s5888_s12 = scalar_lea.sflag [#allocation10], %s6669_s1 }
  0x3d   : > { %s5884_s11 = scalar_lea.hbm %s6668_s6, %s4836_s27  ;;  %s5524_s28 = scalar_lea.hbm %s6668_s6, 32 }
  0x3e   : > { %s5519_s14 = scalar_lea.hbm %s5884_s11, 16  ;;  %p5525_p0 = scmp.lt.u32.totalorder %s5884_s11, %s6668_s6 }
  0x3f   : > { %p5520_p9 = scmp.ne.s32.totalorder %s5884_s11, %s5519_s14  ;;  %p5526_p1 = scmp.lt.u32.totalorder %s5524_s28, %s5519_s14 }
  0x40   : > { %p5528_p3 = scmp.lt.u32.totalorder %s5519_s14, %s5884_s11 }
  0x41   : > { %p5522_p12 = pnand %p5520_p9, %p5848_p7  ;;  %p5527_p2 = por %p5526_p1, %p5525_p0 }
  0x43   : > { %p5523_p13 = pneg %p5522_p12  ;;  %p5529_p4 = por %p5528_p3, %p5527_p2 }
  0x45   : > { %p5530_p6 = pnand %p5529_p4, %p5523_p13 }
  0x47   : > { %5533 = shalt.err (!%p5530_p6)
}
  0x48   : > { %s5534_s1 = scalar_lea.vmem %s426_s4, 16  ;;  %s5714_s27 = smov [#allocation9]  }
  0x49   : > { %p5535_p8 = scmp.ne.s32.totalorder %s426_s4, %s5534_s1  ;;  %s5539_s30 = sshll.u32 %s5714_s27, 4  ;;  %s5540_s30 = int_to_ptr.vmem [resolvable:$false] %s5539_s30 }
  0x4a   : > { %s5541_s25 = scalar_lea.vmem %s5540_s30, 32  ;;  %p5542_p9 = scmp.lt.s32.totalorder %s426_s4, %s5540_s30 }
  0x4b   : > { %p5537_p10 = pnand %p5535_p8, %p5848_p7  ;;  %p5543_p12 = scmp.lt.s32.totalorder %s5541_s25, %s5534_s1 }
  0x4d   : > { %p5538_p11 = pneg %p5537_p10  ;;  %p5544_p5 = por %p5543_p12, %p5542_p9 }
  0x4f   : > { %p5545_p0 = pnand %p5544_p5, %p5538_p11 }
  0x51   : > { %5548 = shalt.err (!%p5545_p0)
}
  0x52   : > { %p6670_p1 = scmp.ne.s32.totalorder %s6664_s15, 0  ;;  %s5909_s14 = sadd.s32 4294967295, %s5709_s20  }
  0x53   : > { %p6647_p5 = scmp.eq.s32.totalorder %s5909_s14, 0  ;;  %p143_p13 = scmp.ne.s32.totalorder %s5701_s18, %s5697_s17 }
  0x54   : > { %5392 = dma.hbm_to_vmem [thread:$0]  (!%p6670_p1), %s5884_s11, 16, %s426_s4, %s5888_s12  }
  0x55   : > { %p4827_p2 = scmp.ge.s32.totalorder %s5709_s20, 1  ;;  %p326_p3 = scmp.lt.s32.totalorder %s5709_s20, 3 }
  0x56   : > { %p5919_p6 = por %p6647_p5, %p143_p13  ;;  %s5715_s11 = smov [#allocation3]  }
  0x57   : > { %p5923_p8 = pnand %p4827_p2, %p326_p3  ;;  %s338_s22 = sshll.u32 %s5715_s11, 4  ;;  %s5927_s22 = int_to_ptr.vmem [resolvable:$true] %s338_s22 }
  0x58   : > { %s6671_s30 = scalar_select %p5919_p6, 1, 0 }
  0x59   : > { %s6672_s4 = scalar_select %p5923_p8, 1, 0 }
  0x5a   : > { %s4837_s17 = sshll.u32 %s5818_s26, 2  ;;  %s5549_s28 = scalar_lea.hbm %s5838_s23, 512 }
  0x5b   : > { %p5550_p11 = scmp.ne.s32.totalorder %s5838_s23, %s5549_s28  ;;  %s5554_s1 = scalar_lea.hbm %s6665_s5, 1024 }
  0x5c   : > { %p5555_p0 = scmp.lt.u32.totalorder %s5838_s23, %s6665_s5  ;;  %p5556_p13 = scmp.lt.u32.totalorder %s5554_s1, %s5549_s28 }
  0x5d   : > { %p5552_p9 = pnand %p5550_p11, %p5848_p7  ;;  %p5558_p3 = scmp.lt.u32.totalorder %s5549_s28, %s5838_s23 }
  0x5e   : > { %p5557_p2 = por %p5556_p13, %p5555_p0 }
  0x5f   : > { %p5553_p12 = pneg %p5552_p9 }
  0x60   : > { %p5559_p4 = por %p5558_p3, %p5557_p2 }
  0x62   : > { %p5560_p5 = pnand %p5559_p4, %p5553_p12 }
  0x64   : > { %5563 = shalt.err (!%p5560_p5)
}
  0x65   : > { %s5564_s11 = scalar_lea.vmem %s5877_s24, 512  ;;  %s5716_s19 = smov [#allocation8]  }
  0x66   : > { %p5565_p11 = scmp.ne.s32.totalorder %s5877_s24, %s5564_s11  ;;  %s5569_s21 = sshll.u32 %s5716_s19, 4  ;;  %s5570_s21 = int_to_ptr.vmem [resolvable:$false] %s5569_s21 }
  0x67   : > { %s5571_s27 = scalar_lea.vmem %s5570_s21, 1024  ;;  %p5572_p6 = scmp.lt.s32.totalorder %s5877_s24, %s5570_s21 }
  0x68   : > { %p5567_p9 = pnand %p5565_p11, %p5848_p7  ;;  %p5573_p8 = scmp.lt.s32.totalorder %s5571_s27, %s5564_s11 }
  0x6a   : > { %p5568_p10 = pneg %p5567_p9  ;;  %p5574_p0 = por %p5573_p8, %p5572_p6 }
  0x6c   : > { %p5575_p13 = pnand %p5574_p0, %p5568_p10 }
  0x6e   : > { %5578 = shalt.err (!%p5575_p13)
}
  0x6f   : > { %s6673_s28 = smov 128   ;;  %p6674_p5 = scmp.eq.s32.totalorder %s5909_s14, 0 }
  0x70   : > { %5389 = dma.hbm_to_vmem [thread:$0]  (!%p6670_p1), %s5838_s23, 512, %s5877_s24, %s5842_s29, %s6673_s28, %s6673_s28, %s6651_s16  }
  0x71   : > { %p6675_p4 = scmp.ne.s32.totalorder %s6672_s4, 0  ;;  %s4838_s25 = sshll.u32 %s5709_s20, 6 }
  0x72   : > { %s5970_s21 = scalar_lea.hbm %s6633_s8, %s4838_s25  ;;  %s444_s27 = scalar_lea.vmem [#allocation11], %s4837_s17 }
  0x73   : > { %p6676_p12 = pneg %p6675_p4  ;;  %s451_s5 = sshll.u32 %s444_s27, 4  ;;  %s5974_s5 = int_to_ptr.vmem [resolvable:$true] %s451_s5 }
  0x74   : > { %s5579_s24 = scalar_lea.hbm %s6625_s0, 256 }
  0x75   : > { %p5962_p2 = pnand %p6676_p12, %p6674_p5  ;;  %p5580_p6 = scmp.ne.s32.totalorder %s6625_s0, %s5579_s24 }
  0x76   : > { %p5586_p11 = scmp.lt.u32.totalorder %s5579_s24, %s6625_s0 }
  0x77   : > { %p5581_p8 = pneg %p5962_p2 }
  0x79   : > { %p5582_p10 = pnand %p5581_p8, %p5580_p6 }
  0x7b   : > { %p5583_p3 = pneg %p5582_p10 }
  0x7d   : > { %p5588_p9 = pnand %p5586_p11, %p5583_p3 }
  0x7f   : > { %5591 = shalt.err (!%p5588_p9)
}
  0x80   : > { %s5592_s26 = scalar_lea.vmem %s5927_s22, 256  ;;  %p5600_p12 = scmp.lt.s32.totalorder %s5927_s22, %s5927_s22 }
  0x81   : > { %p5593_p0 = scmp.ne.s32.totalorder %s5927_s22, %s5592_s26  ;;  %p5601_p4 = scmp.lt.s32.totalorder %s5592_s26, %s5592_s26 }
  0x83   : > { %p5595_p13 = pnand %p5593_p0, %p5581_p8  ;;  %p5602_p1 = por %p5601_p4, %p5600_p12 }
  0x85   : > { %p5596_p5 = pneg %p5595_p13 }
  0x87   : > { %p5603_p7 = pnand %p5602_p1, %p5596_p5 }
  0x89   : > { %5606 = shalt.err (!%p5603_p7)
}
  0x8a   : > { %s6678_s6 = smov 8   ;;  %s5607_s11 = scalar_lea.hbm %s5970_s21, 64 }
  0x8b   : > { %5382 = dma.hbm_to_vmem [thread:$0]  (!%p5962_p2), %s6625_s0, 256, %s5927_s22, [#allocation4], %s6673_s28, %s6673_s28, %s6678_s6  }
  0x8c   : > { %p5608_p6 = scmp.ne.s32.totalorder %s5970_s21, %s5607_s11  ;;  %p6679_p4 = scmp.ne.s32.totalorder %s6666_s13, 0 }
  0x8d   : > { %s5612_s27 = scalar_lea.hbm %s6633_s8, 128  ;;  %p5613_p8 = scmp.lt.u32.totalorder %s5970_s21, %s6633_s8 }
  0x8e   : > { %p5610_p1 = pnand %p5608_p6, %p6679_p4  ;;  %p5614_p10 = scmp.lt.u32.totalorder %s5612_s27, %s5607_s11 }
  0x8f   : > { %p5616_p11 = scmp.lt.u32.totalorder %s5607_s11, %s5970_s21 }
  0x90   : > { %p5611_p7 = pneg %p5610_p1  ;;  %p5615_p3 = por %p5614_p10, %p5613_p8 }
  0x92   : > { %p5617_p9 = por %p5616_p11, %p5615_p3 }
  0x94   : > { %p5618_p0 = pnand %p5617_p9, %p5611_p7 }
  0x96   : > { %5621 = shalt.err (!%p5618_p0)
}
  0x97   : > { %s5622_s22 = scalar_lea.vmem %s5974_s5, 64  ;;  %s5717_s28 = smov [#allocation11]  }
  0x98   : > { %p5623_p2 = scmp.ne.s32.totalorder %s5974_s5, %s5622_s22  ;;  %s5627_s24 = sshll.u32 %s5717_s28, 4  ;;  %s5628_s24 = int_to_ptr.vmem [resolvable:$false] %s5627_s24 }
  0x99   : > { %s5629_s20 = scalar_lea.vmem %s5628_s24, 128  ;;  %p5630_p12 = scmp.lt.s32.totalorder %s5974_s5, %s5628_s24 }
  0x9a   : > { %p5625_p13 = pnand %p5623_p2, %p6679_p4  ;;  %p5631_p6 = scmp.lt.s32.totalorder %s5629_s20, %s5622_s22 }
  0x9c   : > { %p5626_p5 = pneg %p5625_p13  ;;  %p5632_p1 = por %p5631_p6, %p5630_p12 }
  0x9e   : > { %p5633_p8 = pnand %p5632_p1, %p5626_p5 }
  0xa0   : > { %5636 = shalt.err (!%p5633_p8)
}
  0xa1   : > { %p6680_p7 = scmp.ne.s32.totalorder %s6664_s15, 0  ;;  %p6681_p10 = scmp.ne.s32.totalorder %s6672_s4, 0 }
  0xa2   : > { %p6682_p4 = scmp.eq.s32.totalorder (!%p6681_p10), %s5909_s14, 0 }
  0xa3   : > { %5395 = dma.hbm_to_vmem [thread:$0]  (!%p6680_p7), %s5970_s21, 64, %s5974_s5, %s5888_s12  }
  0xa4   : > { %467 = sbr.rel (%p6681_p10) target bundleno = 3776 (0xec0), region = 64 }
  0xab   : > { %5680 = dma.done.wait (%p6682_p4), [#allocation4], 256   ;;  %p6683_p3 = pmov %p6682_p4 }
  0xac   : > { %s473_s13 = sand.u32 1, %s5909_s14   ;;  %s6030_s25 = sand.u32 1, %s5701_s18  }
  0xad   : > { %5682 = vsyncadd (%p6683_p3), [#allocation4], 4294967040  ;;  %s4841_s15 = sshll.u32 %s6030_s25, 5  ;;  %s474_s26 = scalar_lea.sflag [#allocation7], %s473_s13 }
  0xae   : > { %s6033_s6 = scalar_lea.vmem [#allocation6], %s4841_s15  ;;  %p6684_p11 = scmp.ne.s32.totalorder %s6671_s30, 0 }
  0xb0   : > { %5684 = dma.done.wait (%p6684_p11), %s474_s26, 1024  }
  0xb1   : > { %5686 = vsyncadd (%p6684_p11), %s474_s26, 4294966272  ;;  %s6039_s5 = scalar_lea.vmem [#allocation8], %s4841_s15  ;;  %s492_s12 = scalar_lea.sflag [#allocation10], %s473_s13 }
  0xb2   : > { %5688 = dma.done.wait (%p6684_p11), %s492_s12, 80  }
  0xb3   : > { %5690 = vsyncadd (%p6684_p11), %s492_s12, 4294967216  ;;  %s4843_s21 = sshll.u32 %s6030_s25, 2  ;;  %p569_p9 = scmp.lt.s32.totalorder %s5909_s14, 1 }
  0xb4   : > { %s6069_s4 = scalar_lea.vmem [#allocation11], %s4843_s21  ;;  %p6685_p0 = scmp.ne.s32.totalorder %s5909_s14, 0 }
  0xb5   : > { %s570_s16 = scalar_select %p569_p9, %s5909_s14, 1 }
  0xb6   : > { %590 = sbr.rel (%p6685_p0) target bundleno = 501 (0x1f5), region = 88  ;;  %v591_v0 = vld [vmem:[#allocation3] sm:$0xff] (!%p6685_p0)  ;;  %vm595_vm0 = vcmask (!%p6685_p0), 261120   ;;  %v592_v1 = vld [vmem:[#allocation3 + $0x8] sm:$0xff] (!%p6685_p0)  ;;  %v4849_v21 = vld [vmem:[%s6635_s10] ss:$0 sm:$0xff] (!%p6685_p0) }
  0xb7   : > { %s5361_s17 = smul.u32 96, %s570_s16  ;;  %s4954_s11 = sshll.u32 %s570_s16, 6  ;;  %v596_v2 = vsel (!%p6685_p0), %vm595_vm0, %v591_v0, 0.0  ;;  %v599_v3 = vsel (!%p6685_p0), %vm595_vm0, %v592_v1, 0.0  ;;  %v4850_v23 = vld [vmem:[%s6635_s10 + $0x1] ss:$0 sm:$0xff] (!%p6685_p0) }
  0xb8   : > { %s5362_s19 = smul.u32 12, %s570_s16  ;;  %s6052_s23 = scalar_lea.vmem %s6632_s7, %s4954_s11  ;;  %597 = vadd.xlane.f32.xlu0 (!%p6685_p0), %v596_v2 }
  0xb9   : > { %s6057_s28 = scalar_lea.vmem %s6627_s2, %s5361_s17  ;;  %s4847_s30 = sshll.u32 %s570_s16, 1 }
  0xba   : > { %s6062_s13 = scalar_lea.vmem %s6628_s3, %s5362_s19  ;;  %s6067_s12 = scalar_lea.vmem %s6634_s9, %s4847_s30 }
  0xbc   : > { %600 = vadd.xlane.f32.xlu0 (!%p6685_p0), %v599_v3 }
 0x145   : > { %v598_v4 = vpop.xlane.xlu0 %597 }
 0x146   : > { %v603_v5 = vmul.f32 0.03125, %v598_v4 }
 0x148   : > { %v605_v6 = vsub.f32 %v591_v0, %v603_v5 }
 0x149   : > { %v601_v7 = vpop.xlane.xlu0 %600 }
 0x14a   : > { %v604_v8 = vmul.f32 0.03125, %v601_v7  ;;  %v607_v9 = vmul.f32 %v605_v6, %v605_v6 }
 0x14c   : > { %v606_v10 = vsub.f32 %v592_v1, %v604_v8  ;;  %v609_v11 = vsel %vm595_vm0, %v607_v9, 0.0 }
 0x14d   : > { %610 = vadd.xlane.f32.xlu1 %v609_v11 }
 0x14e   : > { %v608_v12 = vmul.f32 %v606_v10, %v606_v10 }
 0x150   : > { %v612_v13 = vsel %vm595_vm0, %v608_v12, 0.0 }
 0x151   : > { %613 = vadd.xlane.f32.xlu1 %v612_v13 }
 0x1da   : > { %v611_v14 = vpop.xlane.xlu1 %610 }
 0x1db   : > { %v615_v15 = vmul.f32 0.03125, %v611_v14 }
 0x1dd   : > { %v617_v16 = vadd.f32 1e-12, %v615_v15 }
 0x1de   : > { %v614_v17 = vpop.xlane.xlu1 %613 }
 0x1df   : > { %5441 = vrsqrt.f32 %v617_v16  ;;  %v616_v18 = vmul.f32 0.03125, %v614_v17 }
 0x1e1   : > { %v618_v19 = vadd.f32 1e-12, %v616_v18 }
 0x1e3   : > { %5443 = vrsqrt.f32 %v618_v19 }
 0x1e9   : > { %v5442_v20 = vpop.eup %5441 }
 0x1ea   : > { %v621_v22 = vmul.f32 %v5442_v20, %v605_v6 }
 0x1ec   : > { %v627_v24 = vmul.f32 %v4849_v21, %v621_v22 }
 0x1ed   : > { %v5444_v25 = vpop.eup %5443 }
 0x1ee   : > { %v633_v26 = vadd.f32 %v4850_v23, %v627_v24  ;;  %v622_v27 = vmul.f32 %v5444_v25, %v606_v10 }
 0x1f0   : > { %635 = vst.msk [vmem:[#allocation2] sm:$0xff] %vm595_vm0, %v633_v26  ;;  %v628_v28 = vmul.f32 %v4849_v21, %v622_v27 }
 0x1f2   : > { %v634_v29 = vadd.f32 %v4850_v23, %v628_v28 }
 0x1f4   : > { %636 = vst.msk [vmem:[#allocation2 + $0x8] sm:$0xff] %vm595_vm0, %v634_v29 }
 0x1f5 PF: > { %v6086_v30 = vld [vmem:[%s6057_s28] sm:$0xff]  ;;  %vm742_vm1 = vcmask 261120   ;;  %v6089_v31 = vld [vmem:[%s6057_s28 + $0x18] sm:$0xff]  ;;  %v5718_v32 = vmov 0.0   ;;  %vm5719_vm2 = vmmov 0   ;;  %v6104_v34 = vld [vmem:[%s6057_s28 + $0x8] sm:$0xff]  ;;  %v1626_v28 = vlaneseq }
 0x1f6   : > { %5067 = vmatprep.subr.mxu0 %v5718_v32  ;;  %5082 = vmatprep.subr.mxu1 %v5718_v32  ;;  %v6107_v35 = vld [vmem:[%s6057_s28 + $0x28] sm:$0xff]  ;;  %v6124_v36 = vld [vmem:[%s6057_s28 + $0x10] sm:$0xff]  ;;  %v6129_v37 = vld [vmem:[%s6057_s28 + $0x38] sm:$0xff]  ;;  %vm1630_vm3 = vcmask 64512   ;;  %s6686_s27 = sld [smem:[#allocation20_spill]]  ;;  %vm4521_vm4 = vcmask 523264  }
 0x1f7   : > { %5068 = vmatpush3.xpose.msk.msra.mxu0 %vm742_vm1, %v6086_v30  ;;  %5083 = vmatpush3.xpose.msk.msra.mxu1 %vm742_vm1, %v6089_v31  ;;  %v6097_v33 = vld [vmem:[#allocation2] sm:$0xff]  ;;  %v6151_v39 = vld [vmem:[%s6057_s28 + $0x48] sm:$0xff]  ;;  %v6161_v40 = vld [vmem:[%s6057_s28 + $0x30] sm:$0xff]  ;;  %v6279_v29 = vshrl.u32 %v1626_v28, 7  ;;  %p5399_p2 = scmp.eq.s32.totalorder %s5909_s14, 1 }
 0x1f8   : > { %5069 = vmatprep.mubr.msk.f32.mxu0 %vm5719_vm2, %v5718_v32  ;;  %5084 = vmatprep.mubr.msk.f32.mxu1 %vm5719_vm2, %v5718_v32  ;;  %v6143_v38 = vld [vmem:[%s6057_s28 + $0x20] sm:$0xff]  ;;  %v6184_v41 = vld [vmem:[%s6057_s28 + $0x58] sm:$0xff]  ;;  %v6202_v43 = vld [vmem:[%s6057_s28 + $0x50] sm:$0xff] }
 0x1f9   : > { %5072 = vmatprep.subr.mxu0 %v5718_v32  ;;  %5092 = vmatprep.subr.mxu1 %v5718_v32  ;;  %v6190_v42 = vld [vmem:[%s6057_s28 + $0x40] sm:$0xff]  ;;  %v6243_v6 = vld [vmem:[%s6062_s13 + $0x9] ss:$0 sm:$0xff]  ;;  %v6273_v21 = vld [vmem:[%s6062_s13 + $0x8] ss:$0 sm:$0xff] }
 0x1fa   : > { %5070 = vmatmul.mubr.msk.f32.vlgmr.msra.gmra.mrb[0].mxu0 %vm742_vm1, %v6097_v33  ;;  %5085 = vmatmul.mubr.msk.f32.vlgmr.msra.gmra.mrb[0].mxu1 %vm742_vm1, %v6097_v33  ;;  %v6214_v48 = vld [vmem:[%s6062_s13 + $0x1] ss:$0 sm:$0xff]  ;;  %v6217_v49 = vld [vmem:[%s6062_s13 + $0x5] ss:$0 sm:$0xff]  ;;  %v6220_v50 = vld [vmem:[%s6062_s13 + $0x3] ss:$0 sm:$0xff] }
 0x1fb   : > { %5073 = vmatpush3.xpose.msk.msra.mxu0 %vm742_vm1, %v6104_v34  ;;  %5093 = vmatpush3.xpose.msk.msra.mxu1 %vm742_vm1, %v6107_v35  ;;  %v6227_v59 = vld [vmem:[%s6062_s13 + $0x7] ss:$0 sm:$0xff]  ;;  %v6231_v61 = vld [vmem:[%s6062_s13] ss:$0 sm:$0xff]  ;;  %v6236_v1 = vld [vmem:[%s6062_s13 + $0x4] ss:$0 sm:$0xff] }
 0x1fc   : > { %5074 = vmatprep.mubr.msk.f32.mxu0 %vm5719_vm2, %v5718_v32  ;;  %5094 = vmatprep.mubr.msk.f32.mxu1 %vm5719_vm2, %v5718_v32  ;;  %v6246_v7 = vld [vmem:[%s6062_s13 + $0x2] ss:$0 sm:$0xff]  ;;  %v6251_v10 = vld [vmem:[%s6062_s13 + $0x6] ss:$0 sm:$0xff] }
 0x1fd   : > { %5077 = vmatprep.subr.mxu0 %v5718_v32  ;;  %5102 = vmatprep.subr.mxu1 %v5718_v32 }
 0x1fe   : > { %5075 = vmatmul.mubr.msk.f32.vlgmr.msra.gmra.mrb[2].mxu0 %vm742_vm1, %v6097_v33  ;;  %5095 = vmatmul.mubr.msk.f32.vlgmr.msra.gmra.mrb[2].mxu1 %vm742_vm1, %v6097_v33 }
 0x1ff   : > { %5078 = vmatpush3.xpose.msk.msra.mxu0 %vm742_vm1, %v6124_v36  ;;  %5079 = vmatprep.mubr.msk.f32.mxu0 %vm5719_vm2, %v5718_v32 }
 0x200   : > { %5103 = vmatpush3.xpose.msk.msra.mxu1 %vm742_vm1, %v6129_v37  ;;  %5087 = vmatprep.subr.mxu0 %v5718_v32 }
 0x201   : > { %5104 = vmatprep.mubr.msk.f32.mxu1 %vm5719_vm2, %v5718_v32  ;;  %5112 = vmatprep.subr.mxu1 %v5718_v32 }
 0x202   : > { %5080 = vmatmul.mubr.msk.f32.vlgmr.msra.gmra.mrb[4].mxu0 %vm742_vm1, %v6097_v33 }
 0x203   : > { %5088 = vmatpush3.xpose.msk.msra.mxu0 %vm742_vm1, %v6143_v38  ;;  %5105 = vmatmul.mubr.msk.f32.vlgmr.msra.gmra.mrb[4].mxu1 %vm742_vm1, %v6097_v33 }
 0x204   : > { %5089 = vmatprep.mubr.msk.f32.mxu0 %vm5719_vm2, %v5718_v32  ;;  %5097 = vmatprep.subr.mxu0 %v5718_v32 }
 0x205   : > { %5113 = vmatpush3.xpose.msk.msra.mxu1 %vm742_vm1, %v6151_v39  ;;  %5114 = vmatprep.mubr.msk.f32.mxu1 %vm5719_vm2, %v5718_v32 }
 0x206   : > { %5090 = vmatmul.mubr.msk.f32.vlgmr.msra.gmra.mrb[6].mxu0 %vm742_vm1, %v6097_v33  ;;  %5122 = vmatprep.subr.mxu1 %v5718_v32 }
 0x207   : > { %5098 = vmatpush3.xpose.msk.msra.mxu0 %vm742_vm1, %v6161_v40  ;;  %5099 = vmatprep.mubr.msk.f32.mxu0 %vm5719_vm2, %v5718_v32 }
 0x208   : > { %5115 = vmatmul.mubr.msk.f32.vlgmr.msra.gmra.mrb[6].mxu1 %vm742_vm1, %v6097_v33  ;;  %5107 = vmatprep.subr.mxu0 %v5718_v32 }
 0x209   : > { %5124 = vmatprep.mubr.msk.f32.mxu1 %vm5719_vm2, %v5718_v32  ;;  %5123 = vmatpush3.xpose.msk.msra.mxu1 %vm742_vm1, %v6184_v41 }
 0x20a   : > { %5100 = vmatmul.mubr.msk.f32.vlgmr.msra.gmra.mrb[8].mxu0 %vm742_vm1, %v6097_v33  ;;  %5132 = vmatprep.subr.mxu1 %v5718_v32 }
 0x20b   : > { %5109 = vmatprep.mubr.msk.f32.mxu0 %vm5719_vm2, %v5718_v32  ;;  %5108 = vmatpush3.xpose.msk.msra.mxu0 %vm742_vm1, %v6190_v42 }
 0x20c   : > { %5125 = vmatmul.mubr.msk.f32.vlgmr.msra.gmra.mrb[8].mxu1 %vm742_vm1, %v6097_v33  ;;  %5117 = vmatprep.subr.mxu0 %v5718_v32 }
 0x20d   : > { %5134 = vmatprep.mubr.msk.f32.mxu1 %vm5719_vm2, %v5718_v32 }
 0x20e   : > { %5110 = vmatmul.mubr.msk.f32.vlgmr.msra.gmra.mrb[10].mxu0 %vm742_vm1, %v6097_v33 }
 0x20f   : > { %5118 = vmatpush3.xpose.msk.msra.mxu0 %vm742_vm1, %v6202_v43  ;;  %5119 = vmatprep.mubr.msk.f32.mxu0 %vm5719_vm2, %v5718_v32 }
 0x210   : > { %5127 = vmatprep.subr.mxu0 %v5718_v32 }
 0x212   : > { %5120 = vmatmul.mubr.msk.f32.vlgmr.msra.gmra.mrb[12].mxu0 %vm742_vm1, %v6097_v33 }
 0x213   : > { %5129 = vmatprep.mubr.msk.f32.mxu0 %vm5719_vm2, %v5718_v32 }
 0x2cd   : > { %v815_v44 = vpop.f32.mrb[0].mxu0  ;;  %v1034_v45 = vpop.f32.mrb[0].mxu1 }
 0x2ce   : > { %v5071_v46 = vpop.f32.mrb[1].mxu0  ;;  %v5086_v47 = vpop.f32.mrb[1].mxu1  ;;  %v1035_v57 = vadd.f32 %v6220_v50, %v1034_v45  ;;  %v816_v4 = vadd.f32 %v6231_v61, %v815_v44 }
 0x2cf   : > { %v6282_v46 = vsub.s32 0, %v6279_v29  ;;  %v6287_v47 = vld [vmem:[%s6686_s27] sm:$0x3] }
 0x2d0   : > { %v1625_v3 = vmul.f32 0.35355338, %v1035_v57  ;;  %v1622_v14 = vmul.f32 0.35355338, %v816_v4 }
 0x2d1   : > { %v888_v51 = vpop.f32.mrb[2].mxu0  ;;  %v1180_v52 = vpop.f32.mrb[2].mxu1 }
 0x2d2   : > { %v889_v53 = vadd.f32 %v6214_v48, %v888_v51  ;;  %v1181_v54 = vadd.f32 %v6217_v49, %v1180_v52  ;;  %v5076_v55 = vpop.f32.mrb[3].mxu0  ;;  %v5096_v56 = vpop.f32.mrb[3].mxu1 }
 0x2d4   : > { %v1623_v58 = vmul.f32 0.35355338, %v889_v53  ;;  %5133 = vmatpush3.xpose.msk.msra.mxu1 %vm1630_vm3, %v1181_v54  ;;  %v1629_v53 = vrot.slane %v6287_v47, %v6282_v46 }
 0x2d5   : > { %v961_v60 = vpop.f32.mrb[4].mxu0  ;;  %5142 = vmatprep.subr.mxu1 %v5718_v32 }
 0x2d6   : > { %v5081_v62 = vpop.f32.mrb[5].mxu0  ;;  %v1326_v63 = vpop.f32.mrb[4].mxu1  ;;  %v962_v15 = vadd.f32 %v6246_v7, %v961_v60 }
 0x2d7   : > { %v1327_v0 = vadd.f32 %v6227_v59, %v1326_v63  ;;  %5135 = vmatmul.mubr.msk.f32.vlgmr.msra.gmra.mrb[10].mxu1 %vm1630_vm3, %v1623_v58  ;;  %v5106_v2 = vpop.f32.mrb[5].mxu1 }
 0x2d8   : > { %5144 = vmatprep.mubr.msk.f32.mxu1 %vm5719_vm2, %v5718_v32  ;;  %v1624_v19 = vmul.f32 0.35355338, %v962_v15 }
 0x2d9   : > { %v1107_v5 = vpop.f32.mrb[6].mxu0  ;;  %5143 = vmatpush3.xpose.msk.msra.mxu1 %vm1630_vm3, %v1327_v0 }
 0x2da   : > { %v1108_v8 = vadd.f32 %v6236_v1, %v1107_v5  ;;  %v5091_v9 = vpop.f32.mrb[7].mxu0  ;;  %5152 = vmatprep.subr.mxu1 %v5718_v32 }
 0x2db   : > { %v1472_v11 = vpop.f32.mrb[6].mxu1 }
 0x2dc   : > { %5128 = vmatpush3.xpose.msk.msra.mxu0 %vm1630_vm3, %v1108_v8  ;;  %5145 = vmatmul.mubr.msk.f32.vlgmr.msra.gmra.mrb[12].mxu1 %vm1630_vm3, %v1625_v3  ;;  %v1473_v12 = vadd.f32 %v6243_v6, %v1472_v11  ;;  %v5116_v13 = vpop.f32.mrb[7].mxu1 }
 0x2dd   : > { %v1253_v16 = vpop.f32.mrb[8].mxu0  ;;  %5137 = vmatprep.subr.mxu0 %v5718_v32  ;;  %5154 = vmatprep.mubr.msk.f32.mxu1 %vm5719_vm2, %v5718_v32 }
 0x2de   : > { %v1254_v17 = vadd.f32 %v6251_v10, %v1253_v16  ;;  %v5101_v18 = vpop.f32.mrb[9].mxu0  ;;  %5153 = vmatpush3.msra.mxu1 %v1473_v12 }
 0x2df   : > { %5130 = vmatmul.mubr.msk.f32.vlgmr.msra.gmra.mrb[14].mxu0 %vm1630_vm3, %v1622_v14  ;;  %5162 = vmatprep.subr.mxu1 %v5718_v32  ;;  %v6270_v20 = vpop.f32.mrb[8].mxu1 }
 0x2e0   : > { %5138 = vmatpush3.xpose.msk.msra.mxu0 %vm1630_vm3, %v1254_v17  ;;  %5139 = vmatprep.mubr.msk.f32.mxu0 %vm5719_vm2, %v5718_v32  ;;  %v5126_v22 = vpop.f32.mrb[9].mxu1 }
 0x2e1   : > { %5147 = vmatprep.subr.mxu0 %v5718_v32  ;;  %v1399_v23 = vpop.f32.mrb[10].mxu0 }
 0x2e2   : > { %v1400_v24 = vadd.f32 %v6273_v21, %v1399_v23  ;;  %v5111_v25 = vpop.f32.mrb[11].mxu0 }
 0x2e3   : > { %5140 = vmatmul.mubr.msk.f32.vlgmr.msra.gmra.mrb[16].mxu0 %vm1630_vm3, %v1624_v19 }
 0x2e4   : > { %5149 = vmatprep.mubr.msk.f32.mxu0 %vm5719_vm2, %v5718_v32  ;;  %5148 = vmatpush3.msra.mxu0 %v1400_v24 }
 0x2e5   : > { %v6276_v26 = vpop.f32.mrb[12].mxu0  ;;  %5157 = vmatprep.subr.mxu0 %v5718_v32 }
 0x2e6   : > { %v5121_v27 = vpop.f32.mrb[13].mxu0 }
 0x3aa   : > { %v1779_v44 = vpop.f32.mrb[10].mxu1 }
 0x3ab   : > { %v5136_v45 = vpop.f32.mrb[11].mxu1  ;;  %v1780_v57 = vadd.f32 %v1779_v44, %v1629_v53 }
 0x3ad   : > { %v1938_v2 = vsel %vm1630_vm3, %v1780_v57, -inf }
 0x3af   : > { %v1931_v51 = vpop.f32.mrb[12].mxu1 }
 0x3b0   : > { %v5146_v52 = vpop.f32.mrb[13].mxu1  ;;  %v1932_v0 = vadd.f32 %v1931_v51, %v1629_v53 }
 0x3b2   : > { %v1703_v54 = vpop.f32.mrb[14].mxu0  ;;  %v1944_v4 = vsel %vm1630_vm3, %v1932_v0, -inf }
 0x3b3   : > { %v1704_v55 = vadd.f32 %v1703_v54, %v1629_v53  ;;  %v5131_v56 = vpop.f32.mrb[15].mxu0 }
 0x3b5   : > { %v1935_v58 = vsel %vm1630_vm3, %v1704_v55, -inf }
 0x3b6   : > { %1936 = vmax.xlane.f32.xlu0 %v1935_v58  ;;  %v1855_v60 = vpop.f32.mrb[16].mxu0 }
 0x3b7   : > { %v1856_v62 = vadd.f32 %v1855_v60, %v1629_v53  ;;  %v5141_v63 = vpop.f32.mrb[17].mxu0  ;;  %v6305_v60 = vld [vmem:[%s6062_s13 + $0xb] ss:$0 sm:$0xff] }
 0x3b9   : > { %v1941_v3 = vsel %vm1630_vm3, %v1856_v62, -inf }
 0x3ba   : > { %1939 = vmax.xlane.f32.xlu0 %v1938_v2  ;;  %1942 = vmax.xlane.f32.xlu1 %v1941_v3  ;;  %v1619_v2 = vadd.f32 %v6305_v60, %v6270_v20  ;;  %v6329_v20 = vld [vmem:[%s6033_s6 + $0x8] sm:$0xff] }
 0x3be   : > { %1945 = vmax.xlane.f32.xlu1 %v1944_v4  ;;  %v6314_v4 = vld [vmem:[%s6033_s6] sm:$0xff] }
 0x443   : > { %v1937_v5 = vpop.xlane.xlu0 %1936 }
 0x444   : > { %v1947_v8 = vsub.f32 %v1704_v55, %v1937_v5  ;;  %v6300_v55 = vld [vmem:[%s6062_s13 + $0xa] ss:$0 sm:$0xff] }
 0x445   : > { %v1546_v58 = vadd.f32 %v6300_v55, %v6276_v26 }
 0x446   : > { %v1951_v9 = vmul.f32 1.442695, %v1947_v8  ;;  %v6334_v8 = vld [vmem:[%s6033_s6 + $0x10] sm:$0xff] }
 0x447   : > { %v1940_v11 = vpop.xlane.xlu0 %1939  ;;  %v1943_v12 = vpop.xlane.xlu1 %1942 }
 0x448   : > { %5445 = vpow2.f32 %v1951_v9  ;;  %v1948_v13 = vsub.f32 %v1780_v57, %v1940_v11  ;;  %v1949_v14 = vsub.f32 %v1856_v62, %v1943_v12  ;;  %v6341_v12 = vld [vmem:[%s6033_s6 + $0x18] sm:$0xff]  ;;  %s6687_s6 = scalar_lea.vmem [#allocation9], %s6030_s25  ;;  %s5720_s25 = smov [#allocation12]  }
 0x44a   : > { %v1953_v15 = vmul.f32 1.442695, %v1948_v13  ;;  %v1955_v16 = vmul.f32 1.442695, %v1949_v14 }
 0x44b   : > { %v1946_v17 = vpop.xlane.xlu1 %1945 }
 0x44c   : > { %5447 = vpow2.f32 %v1953_v15  ;;  %v1950_v18 = vsub.f32 %v1932_v0, %v1946_v17 }
 0x44d   : > { %5449 = vpow2.f32 %v1955_v16 }
 0x44e   : > { %v1957_v19 = vmul.f32 1.442695, %v1950_v18 }
 0x450   : > { %5451 = vpow2.f32 %v1957_v19  ;;  %v6355_v19 = vld [vmem:[#allocation2 + $0x8] sm:$0xff] }
 0x452   : > { %v5446_v22 = vpop.eup %5445 }
 0x453   : > { %v1959_v23 = vsel %vm1630_vm3, %v5446_v22, 0.0 }
 0x454   : > { %1960 = vadd.xlane.f32.xlu0 %v1959_v23 }
 0x456   : > { %v5448_v24 = vpop.eup %5447 }
 0x457   : > { %v5450_v25 = vpop.eup %5449  ;;  %v1962_v27 = vsel %vm1630_vm3, %v5448_v24, 0.0 }
 0x458   : > { %1963 = vadd.xlane.f32.xlu1 %v1962_v27  ;;  %v1965_v28 = vsel %vm1630_vm3, %v5450_v25, 0.0 }
 0x459   : > { %1966 = vadd.xlane.f32.xlu0 %v1965_v28 }
 0x45a   : > { %v5452_v44 = vpop.eup %5451 }
 0x45b   : > { %v1968_v45 = vsel %vm1630_vm3, %v5452_v44, 0.0 }
 0x45c   : > { %1969 = vadd.xlane.f32.xlu1 %v1968_v45 }
 0x4e1   : > { %v1961_v51 = vpop.xlane.xlu0 %1960 }
 0x4e2   : > { %5453 = vrcp.f32 %v1961_v51 }
 0x4e5   : > { %v1964_v52 = vpop.xlane.xlu1 %1963 }
 0x4e6   : > { %v1967_v53 = vpop.xlane.xlu0 %1966  ;;  %5455 = vrcp.f32 %v1964_v52 }
 0x4e7   : > { %5457 = vrcp.f32 %v1967_v53 }
 0x4e9   : > { %v1970_v54 = vpop.xlane.xlu1 %1969 }
 0x4ea   : > { %5459 = vrcp.f32 %v1970_v54 }
 0x4ec   : > { %v5454_v56 = vpop.eup %5453 }
 0x4ed   : > { %v1975_v57 = vmul.f32 %v5454_v56, %v5446_v22 }
 0x4ef   : > { %5150 = vmatmul.mubr.msk.f32.vlgmr.msra.gmra.mrb[18].mxu0 %vm1630_vm3, %v1975_v57 }
 0x4f0   : > { %v5456_v62 = vpop.eup %5455  ;;  %5158 = vmatpush3.msra.mxu0 %v1546_v58  ;;  %5159 = vmatprep.mubr.msk.f32.mxu0 %vm5719_vm2, %v5718_v32 }
 0x4f1   : > { %v5458_v63 = vpop.eup %5457  ;;  %v1976_v0 = vmul.f32 %v5456_v62, %v5448_v24  ;;  %5167 = vmatprep.subr.mxu0 %v5718_v32 }
 0x4f2   : > { %v1977_v3 = vmul.f32 %v5458_v63, %v5450_v25 }
 0x4f3   : > { %5155 = vmatmul.mubr.msk.f32.vlgmr.msra.gmra.mrb[14].mxu1 %vm1630_vm3, %v1976_v0 }
 0x4f4   : > { %v5460_v26 = vpop.eup %5459  ;;  %5160 = vmatmul.mubr.msk.f32.vlgmr.msra.gmra.mrb[20].mxu0 %vm1630_vm3, %v1977_v3  ;;  %5163 = vmatpush3.msra.mxu1 %v1619_v2 }
 0x4f5   : > { %v1978_v5 = vmul.f32 %v5460_v26, %v5452_v44  ;;  %5164 = vmatprep.mubr.msk.f32.mxu1 %vm5719_vm2, %v5718_v32  ;;  %5168 = vmatpush3.msra.mxu0 %v6314_v4 }
 0x4f6   : > { %5169 = vmatprep.mubr.msk.f32.mxu0 %vm5719_vm2, %v5718_v32  ;;  %5177 = vmatprep.subr.mxu0 %v5718_v32 }
 0x4f7   : > { %5165 = vmatmul.mubr.msk.f32.vlgmr.msra.gmra.mrb[16].mxu1 %vm1630_vm3, %v1978_v5  ;;  %5172 = vmatprep.subr.mxu1 %v5718_v32 }
 0x4f8   : > { %5174 = vmatprep.mubr.msk.f32.mxu1 %vm5719_vm2, %v5718_v32  ;;  %5173 = vmatpush3.msra.mxu1 %v6329_v20 }
 0x4f9   : > { %5182 = vmatprep.subr.mxu1 %v5718_v32 }
 0x5c2   : > { %v2048_v9 = vpop.f32.mrb[18].mxu0 }
 0x5c3   : > { %v5151_v11 = vpop.f32.mrb[19].mxu0  ;;  %5170 = vmatmul.mubr.msk.f32.vlgmr.msra.gmra.mrb[22].mxu0 %vm1630_vm3, %v2048_v9 }
 0x5c4   : > { %5178 = vmatpush3.msra.mxu0 %v6334_v8  ;;  %5179 = vmatprep.mubr.msk.f32.mxu0 %vm5719_vm2, %v5718_v32 }
 0x5c5   : > { %5187 = vmatprep.subr.mxu0 %v5718_v32 }
 0x5c6   : > { %v2121_v13 = vpop.f32.mrb[14].mxu1 }
 0x5c7   : > { %v2194_v14 = vpop.f32.mrb[20].mxu0  ;;  %v5156_v15 = vpop.f32.mrb[15].mxu1  ;;  %5175 = vmatmul.mubr.msk.f32.vlgmr.msra.gmra.mrb[18].mxu1 %vm1630_vm3, %v2121_v13 }
 0x5c8   : > { %v5161_v16 = vpop.f32.mrb[21].mxu0  ;;  %5180 = vmatmul.mubr.msk.f32.vlgmr.msra.gmra.mrb[24].mxu0 %vm1630_vm3, %v2194_v14  ;;  %5183 = vmatpush3.msra.mxu1 %v6341_v12 }
 0x5c9   : > { %5184 = vmatprep.mubr.msk.f32.mxu1 %vm5719_vm2, %v5718_v32  ;;  %5189 = vmatprep.mubr.msk.f32.mxu0 %vm5719_vm2, %v5718_v32 }
 0x5ca   : > { %v2267_v17 = vpop.f32.mrb[16].mxu1  ;;  %5192 = vmatprep.subr.mxu1 %v5718_v32 }
 0x5cb   : > { %5188 = vmatpush3.xpose.msk.msra.mxu0 %vm742_vm1, %v6086_v30  ;;  %v5166_v18 = vpop.f32.mrb[17].mxu1  ;;  %5185 = vmatmul.mubr.msk.f32.vlgmr.msra.gmra.mrb[20].mxu1 %vm1630_vm3, %v2267_v17 }
 0x5cc   : > { %5197 = vmatprep.subr.mxu0 %v5718_v32  ;;  %5194 = vmatprep.mubr.msk.f32.mxu1 %vm5719_vm2, %v5718_v32 }
 0x5ce   : > { %5190 = vmatmul.mubr.msk.f32.vlgmr.msra.gmra.mrb[26].mxu0 %vm742_vm1, %v6355_v19 }
 0x5cf   : > { %5193 = vmatpush3.xpose.msk.msra.mxu1 %vm742_vm1, %v6104_v34  ;;  %5198 = vmatpush3.xpose.msk.msra.mxu0 %vm742_vm1, %v6124_v36 }
 0x5d0   : > { %5199 = vmatprep.mubr.msk.f32.mxu0 %vm5719_vm2, %v5718_v32  ;;  %5202 = vmatprep.subr.mxu1 %v5718_v32 }
 0x5d1   : > { %5207 = vmatprep.subr.mxu0 %v5718_v32 }
 0x5d2   : > { %5195 = vmatmul.mubr.msk.f32.vlgmr.msra.gmra.mrb[22].mxu1 %vm742_vm1, %v6355_v19  ;;  %5200 = vmatmul.mubr.msk.f32.vlgmr.msra.gmra.mrb[28].mxu0 %vm742_vm1, %v6355_v19 }
 0x5d3   : > { %5203 = vmatpush3.xpose.msk.msra.mxu1 %vm742_vm1, %v6089_v31  ;;  %5208 = vmatpush3.xpose.msk.msra.mxu0 %vm742_vm1, %v6143_v38 }
 0x5d4   : > { %5204 = vmatprep.mubr.msk.f32.mxu1 %vm5719_vm2, %v5718_v32  ;;  %5209 = vmatprep.mubr.msk.f32.mxu0 %vm5719_vm2, %v5718_v32 }
 0x5d5   : > { %5212 = vmatprep.subr.mxu1 %v5718_v32  ;;  %5217 = vmatprep.subr.mxu0 %v5718_v32 }
 0x5d6   : > { %5205 = vmatmul.mubr.msk.f32.vlgmr.msra.gmra.mrb[24].mxu1 %vm742_vm1, %v6355_v19  ;;  %5210 = vmatmul.mubr.msk.f32.vlgmr.msra.gmra.mrb[30].mxu0 %vm742_vm1, %v6355_v19 }
 0x5d7   : > { %5213 = vmatpush3.xpose.msk.msra.mxu1 %vm742_vm1, %v6107_v35  ;;  %5218 = vmatpush3.xpose.msk.msra.mxu0 %vm742_vm1, %v6161_v40 }
 0x5d8   : > { %5214 = vmatprep.mubr.msk.f32.mxu1 %vm5719_vm2, %v5718_v32  ;;  %5219 = vmatprep.mubr.msk.f32.mxu0 %vm5719_vm2, %v5718_v32 }
 0x5d9   : > { %5222 = vmatprep.subr.mxu1 %v5718_v32  ;;  %5227 = vmatprep.subr.mxu0 %v5718_v32 }
 0x5da   : > { %5215 = vmatmul.mubr.msk.f32.vlgmr.msra.gmra.mrb[26].mxu1 %vm742_vm1, %v6355_v19  ;;  %5220 = vmatmul.mubr.msk.f32.vlgmr.msra.gmra.mrb[32].mxu0 %vm742_vm1, %v6355_v19 }
 0x5db   : > { %5223 = vmatpush3.xpose.msk.msra.mxu1 %vm742_vm1, %v6129_v37  ;;  %5224 = vmatprep.mubr.msk.f32.mxu1 %vm5719_vm2, %v5718_v32 }
 0x5dc   : > { %5228 = vmatpush3.xpose.msk.msra.mxu0 %vm742_vm1, %v6190_v42  ;;  %5229 = vmatprep.mubr.msk.f32.mxu0 %vm5719_vm2, %v5718_v32 }
 0x5dd   : > { %5232 = vmatprep.subr.mxu1 %v5718_v32  ;;  %5237 = vmatprep.subr.mxu0 %v5718_v32 }
 0x5de   : > { %5225 = vmatmul.mubr.msk.f32.vlgmr.msra.gmra.mrb[28].mxu1 %vm742_vm1, %v6355_v19 }
 0x5df   : > { %5230 = vmatmul.mubr.msk.f32.vlgmr.msra.gmra.mrb[34].mxu0 %vm742_vm1, %v6355_v19  ;;  %5233 = vmatpush3.xpose.msk.msra.mxu1 %vm742_vm1, %v6151_v39 }
 0x5e0   : > { %5238 = vmatpush3.xpose.msk.msra.mxu0 %vm742_vm1, %v6202_v43  ;;  %5234 = vmatprep.mubr.msk.f32.mxu1 %vm5719_vm2, %v5718_v32 }
 0x5e1   : > { %5239 = vmatprep.mubr.msk.f32.mxu0 %vm5719_vm2, %v5718_v32  ;;  %5242 = vmatprep.subr.mxu1 %v5718_v32 }
 0x5e2   : > { %5235 = vmatmul.mubr.msk.f32.vlgmr.msra.gmra.mrb[30].mxu1 %vm742_vm1, %v6355_v19  ;;  %5247 = vmatprep.subr.mxu0 %v5718_v32 }
 0x5e3   : > { %5240 = vmatmul.mubr.msk.f32.vlgmr.msra.gmra.mrb[36].mxu0 %vm742_vm1, %v6355_v19  ;;  %5243 = vmatpush3.xpose.msk.msra.mxu1 %vm742_vm1, %v6184_v41 }
 0x5e4   : > { %5244 = vmatprep.mubr.msk.f32.mxu1 %vm5719_vm2, %v5718_v32  ;;  %5249 = vmatprep.mubr.msk.f32.mxu0 %vm5719_vm2, %v5718_v32 }
 0x5e5   : > { %5252 = vmatprep.subr.mxu1 %v5718_v32 }
 0x5e6   : > { %5245 = vmatmul.mubr.msk.f32.vlgmr.msra.gmra.mrb[32].mxu1 %vm742_vm1, %v6355_v19 }
 0x5e7   : > { %5254 = vmatprep.mubr.msk.f32.mxu1 %vm5719_vm2, %v5718_v32 }
 0x696   : > { %v2340_v30 = vpop.f32.mrb[22].mxu0 }
 0x697   : > { %v5171_v31 = vpop.f32.mrb[23].mxu0  ;;  %v2563_v35 = vsel %vm742_vm1, %v2340_v30, 0.0 }
 0x698   : > { %v6484_v31 = vsub.s32 1, %v6279_v29 }
 0x69a   : > { %v2413_v34 = vpop.f32.mrb[18].mxu1 }
 0x69b   : > { %v2564_v36 = vsel %vm742_vm1, %v2413_v34, 0.0  ;;  %v2486_v37 = vpop.f32.mrb[24].mxu0  ;;  %v5176_v38 = vpop.f32.mrb[19].mxu1  ;;  %v3420_v34 = vrot.slane %v6287_v47, %v6484_v31 }
 0x69c   : > { %v2565_v39 = vadd.f32 %v2564_v36, %v2563_v35  ;;  %v5181_v40 = vpop.f32.mrb[25].mxu0  ;;  %v2566_v41 = vsel %vm742_vm1, %v2486_v37, 0.0 }
 0x69e   : > { %v2567_v42 = vadd.f32 %v2566_v41, %v2565_v39  ;;  %v2559_v43 = vpop.f32.mrb[20].mxu1 }
 0x69f   : > { %v2568_v22 = vsel %vm742_vm1, %v2559_v43, 0.0  ;;  %v5186_v23 = vpop.f32.mrb[21].mxu1 }
 0x6a0   : > { %v6445_v24 = vadd.f32 %v2568_v22, %v2567_v42 }
 0x6a1   : > { %v2639_v25 = vpop.f32.mrb[26].mxu0 }
 0x6a2   : > { %v5191_v27 = vpop.f32.mrb[27].mxu0  ;;  %v2640_v52 = vadd.f32 %v6231_v61, %v2639_v25 }
 0x6a4   : > { %v3413_v62 = vmul.f32 0.35355338, %v2640_v52 }
 0x6a5   : > { %v2709_v28 = vpop.f32.mrb[22].mxu1  ;;  %v2779_v44 = vpop.f32.mrb[28].mxu0 }
 0x6a6   : > { %v5196_v45 = vpop.f32.mrb[23].mxu1  ;;  %v5201_v51 = vpop.f32.mrb[29].mxu0  ;;  %v2710_v63 = vadd.f32 %v6214_v48, %v2709_v28  ;;  %v2780_v0 = vadd.f32 %v6246_v7, %v2779_v44 }
 0x6a8   : > { %v3415_v48 = vmul.f32 0.35355338, %v2780_v0 }
 0x6a9   : > { %v2849_v53 = vpop.f32.mrb[24].mxu1  ;;  %v2919_v54 = vpop.f32.mrb[30].mxu0 }
 0x6aa   : > { %v2920_v56 = vadd.f32 %v6236_v1, %v2919_v54  ;;  %v5206_v57 = vpop.f32.mrb[25].mxu1  ;;  %v5211_v58 = vpop.f32.mrb[31].mxu0  ;;  %v3414_v1 = vmul.f32 0.35355338, %v2710_v63  ;;  %v2850_v7 = vadd.f32 %v6220_v50, %v2849_v53 }
 0x6ac   : > { %5248 = vmatpush3.xpose.msk.msra.mxu0 %vm1630_vm3, %v2920_v56  ;;  %v3416_v50 = vmul.f32 0.35355338, %v2850_v7 }
 0x6ad   : > { %v2989_v2 = vpop.f32.mrb[26].mxu1  ;;  %v3059_v3 = vpop.f32.mrb[32].mxu0  ;;  %5257 = vmatprep.subr.mxu0 %v5718_v32 }
 0x6ae   : > { %v2990_v26 = vadd.f32 %v6217_v49, %v2989_v2  ;;  %v3060_v61 = vadd.f32 %v6251_v10, %v3059_v3  ;;  %v5216_v5 = vpop.f32.mrb[27].mxu1  ;;  %v5221_v9 = vpop.f32.mrb[33].mxu0  ;;  %v6493_v2 = vld [vmem:[%s6067_s12] sm:$0x3] }
 0x6af   : > { %5250 = vmatmul.mubr.msk.f32.vlgmr.msra.gmra.mrb[38].mxu0 %vm1630_vm3, %v3413_v62 }
 0x6b0   : > { %5253 = vmatpush3.xpose.msk.msra.mxu1 %vm1630_vm3, %v2990_v26  ;;  %5258 = vmatpush3.xpose.msk.msra.mxu0 %vm1630_vm3, %v3060_v61  ;;  %v6497_v26 = vrot.slane %v6493_v2, %v6282_v46 }
 0x6b1   : > { %v3129_v11 = vpop.f32.mrb[28].mxu1  ;;  %5259 = vmatprep.mubr.msk.f32.mxu0 %vm5719_vm2, %v5718_v32  ;;  %5262 = vmatprep.subr.mxu1 %v5718_v32 }
 0x6b2   : > { %v3130_v49 = vadd.f32 %v6227_v59, %v3129_v11  ;;  %v5226_v10 = vpop.f32.mrb[29].mxu1  ;;  %v3199_v13 = vpop.f32.mrb[34].mxu0  ;;  %5267 = vmatprep.subr.mxu0 %v5718_v32  ;;  %v4364_v9 = vadd.f32 %v6497_v26, %v6445_v24 }
 0x6b3   : > { %5255 = vmatmul.mubr.msk.f32.vlgmr.msra.gmra.mrb[34].mxu1 %vm1630_vm3, %v3414_v1  ;;  %5260 = vmatmul.mubr.msk.f32.vlgmr.msra.gmra.mrb[40].mxu0 %vm1630_vm3, %v3415_v48  ;;  %v3200_v14 = vadd.f32 %v6273_v21, %v3199_v13  ;;  %v5231_v15 = vpop.f32.mrb[35].mxu0 }
 0x6b4   : > { %5263 = vmatpush3.xpose.msk.msra.mxu1 %vm1630_vm3, %v3130_v49  ;;  %5264 = vmatprep.mubr.msk.f32.mxu1 %vm5719_vm2, %v5718_v32  ;;  %v4366_v49 = vadd.f32 %v4364_v9, %v6097_v33 }
 0x6b5   : > { %v3269_v16 = vpop.f32.mrb[30].mxu1  ;;  %5268 = vmatpush3.msra.mxu0 %v3200_v14  ;;  %5272 = vmatprep.subr.mxu1 %v5718_v32 }
 0x6b6   : > { %v3270_v59 = vadd.f32 %v6243_v6, %v3269_v16  ;;  %v5236_v17 = vpop.f32.mrb[31].mxu1  ;;  %v6472_v18 = vpop.f32.mrb[36].mxu0  ;;  %5269 = vmatprep.mubr.msk.f32.mxu0 %vm5719_vm2, %v5718_v32  ;;  %5277 = vmatprep.subr.mxu0 %v5718_v32  ;;  %v4368_v14 = vsel %vm742_vm1, %v4366_v49, 0.0 }
 0x6b7   : > { %5265 = vmatmul.mubr.msk.f32.vlgmr.msra.gmra.mrb[36].mxu1 %vm1630_vm3, %v3416_v50  ;;  %v5241_v21 = vpop.f32.mrb[37].mxu0 }
 0x6b8   : > { %5273 = vmatpush3.msra.mxu1 %v3270_v59  ;;  %5274 = vmatprep.mubr.msk.f32.mxu1 %vm5719_vm2, %v5718_v32 }
 0x6b9   : > { %v6480_v30 = vpop.f32.mrb[32].mxu1  ;;  %5282 = vmatprep.subr.mxu1 %v5718_v32 }
 0x6ba   : > { %v5246_v6 = vpop.f32.mrb[33].mxu1 }
 0x782   : > { %v3493_v35 = vpop.f32.mrb[38].mxu0 }
 0x783   : > { %v3494_v36 = vadd.f32 %v3493_v35, %v3420_v34  ;;  %v5251_v37 = vpop.f32.mrb[39].mxu0 }
 0x785   : > { %v3725_v38 = vsel %vm1630_vm3, %v3494_v36, -inf }
 0x786   : > { %v3569_v39 = vpop.f32.mrb[34].mxu1  ;;  %3726 = vmax.xlane.f32.xlu0 %v3725_v38  ;;  %v3645_v40 = vpop.f32.mrb[40].mxu0 }
 0x787   : > { %v3570_v41 = vadd.f32 %v3569_v39, %v3420_v34  ;;  %v3646_v42 = vadd.f32 %v3645_v40, %v3420_v34  ;;  %v5256_v43 = vpop.f32.mrb[35].mxu1  ;;  %v5261_v22 = vpop.f32.mrb[41].mxu0  ;;  %v3410_v40 = vadd.f32 %v6305_v60, %v6480_v30 }
 0x788   : > { %v6531_v43 = vld [vmem:[%s6069_s4] sm:$0xf] }
 0x789   : > { %v3728_v23 = vsel %vm1630_vm3, %v3570_v41, -inf  ;;  %v3731_v25 = vsel %vm1630_vm3, %v3646_v42, -inf }
 0x78a   : > { %3729 = vmax.xlane.f32.xlu1 %v3728_v23  ;;  %v3721_v27 = vpop.f32.mrb[36].mxu1  ;;  %3732 = vmax.xlane.f32.xlu0 %v3731_v25  ;;  %v4398_v23 = vrot.slane %v6531_v43, %v6282_v46 }
 0x78b   : > { %v3722_v47 = vadd.f32 %v3721_v27, %v3420_v34  ;;  %v5266_v28 = vpop.f32.mrb[37].mxu1  ;;  %v3340_v34 = vadd.f32 %v6300_v55, %v6472_v18 }
 0x78d   : > { %v3734_v44 = vsel %vm1630_vm3, %v3722_v47, -inf }
 0x78e   : > { %3735 = vmax.xlane.f32.xlu1 %v3734_v44 }
 0x813   : > { %v3727_v45 = vpop.xlane.xlu0 %3726 }
 0x814   : > { %v3737_v51 = vsub.f32 %v3494_v36, %v3727_v45 }
 0x816   : > { %v3741_v52 = vmul.f32 1.442695, %v3737_v51 }
 0x817   : > { %v3730_v53 = vpop.xlane.xlu1 %3729  ;;  %v3733_v54 = vpop.xlane.xlu0 %3732 }
 0x818   : > { %5461 = vpow2.f32 %v3741_v52  ;;  %v3738_v56 = vsub.f32 %v3570_v41, %v3730_v53  ;;  %v3739_v57 = vsub.f32 %v3646_v42, %v3733_v54 }
 0x81a   : > { %v3743_v58 = vmul.f32 1.442695, %v3738_v56  ;;  %v3745_v62 = vmul.f32 1.442695, %v3739_v57 }
 0x81b   : > { %v3736_v63 = vpop.xlane.xlu1 %3735 }
 0x81c   : > { %5463 = vpow2.f32 %v3743_v58  ;;  %v3740_v0 = vsub.f32 %v3722_v47, %v3736_v63  ;;  %v4404_v47 = vrot.slane %v6531_v43, %v6484_v31 }
 0x81d   : > { %5465 = vpow2.f32 %v3745_v62 }
 0x81e   : > { %v3747_v3 = vmul.f32 1.442695, %v3740_v0 }
 0x820   : > { %5467 = vpow2.f32 %v3747_v3 }
 0x822   : > { %v5462_v61 = vpop.eup %5461 }
 0x823   : > { %v3749_v5 = vsel %vm1630_vm3, %v5462_v61, 0.0 }
 0x824   : > { %3750 = vadd.xlane.f32.xlu0 %v3749_v5 }
 0x826   : > { %v5464_v1 = vpop.eup %5463 }
 0x827   : > { %v5466_v48 = vpop.eup %5465  ;;  %v3752_v7 = vsel %vm1630_vm3, %v5464_v1, 0.0 }
 0x828   : > { %3753 = vadd.xlane.f32.xlu1 %v3752_v7  ;;  %v3755_v11 = vsel %vm1630_vm3, %v5466_v48, 0.0 }
 0x829   : > { %3756 = vadd.xlane.f32.xlu0 %v3755_v11 }
 0x82a   : > { %v5468_v10 = vpop.eup %5467 }
 0x82b   : > { %v3758_v13 = vsel %vm1630_vm3, %v5468_v10, 0.0 }
 0x82c   : > { %3759 = vadd.xlane.f32.xlu1 %v3758_v13 }
 0x82d   : > { %4369 = vadd.xlane.f32.xlu0 %v4368_v14 }
 0x8b1   : > { %v3751_v15 = vpop.xlane.xlu0 %3750 }
 0x8b2   : > { %5469 = vrcp.f32 %v3751_v15 }
 0x8b5   : > { %v3754_v24 = vpop.xlane.xlu1 %3753 }
 0x8b6   : > { %5471 = vrcp.f32 %v3754_v24  ;;  %v3757_v50 = vpop.xlane.xlu0 %3756  ;;  %v4407_v24 = vld [vmem:[%s6039_s5] sm:$0xff] }
 0x8b7   : > { %5473 = vrcp.f32 %v3757_v50  ;;  %v4408_v50 = vld [vmem:[%s6039_s5 + $0x8] sm:$0xff] }
 0x8b9   : > { %v3760_v16 = vpop.xlane.xlu1 %3759 }
 0x8ba   : > { %5475 = vrcp.f32 %v3760_v16  ;;  %v4370_v59 = vpop.xlane.xlu0 %4369  ;;  %v5337_v16 = vpack.c.bf16 %v4408_v50, %v4407_v24 }
 0x8bb   : > { %v4375_v17 = vmul.f32 0.03125, %v4370_v59  ;;  %v4410_v59 = vld [vmem:[%s6039_s5 + $0x18] sm:$0xff] }
 0x8bc   : > { %v5470_v21 = vpop.eup %5469 }
 0x8bd   : > { %v3765_v33 = vmul.f32 %v5470_v21, %v5462_v61  ;;  %v4377_v6 = vsub.f32 %v4366_v49, %v4375_v17 }
 0x8bf   : > { %5270 = vmatmul.mubr.msk.f32.vlgmr.msra.gmra.mrb[42].mxu0 %vm1630_vm3, %v3765_v33  ;;  %v4379_v35 = vmul.f32 %v4377_v6, %v4377_v6 }
 0x8c0   : > { %v5472_v36 = vpop.eup %5471  ;;  %5278 = vmatpush3.msra.mxu0 %v3340_v34  ;;  %5279 = vmatprep.mubr.msk.f32.mxu0 %vm5719_vm2, %v5718_v32 }
 0x8c1   : > { %v5474_v37 = vpop.eup %5473  ;;  %v3766_v38 = vmul.f32 %v5472_v36, %v5464_v1  ;;  %v4381_v39 = vsel %vm742_vm1, %v4379_v35, 0.0  ;;  %5287 = vmatprep.subr.mxu0 %v5718_v32 }
 0x8c2   : > { %v3767_v41 = vmul.f32 %v5474_v37, %v5466_v48  ;;  %4382 = vadd.xlane.f32.xlu0 %v4381_v39  ;;  %v4509_v37 = vld [vmem:[%s6052_s23] sm:$0xff] }
 0x8c3   : > { %5275 = vmatmul.mubr.msk.f32.vlgmr.msra.gmra.mrb[38].mxu1 %vm1630_vm3, %v3766_v38  ;;  %v4510_v38 = vld [vmem:[%s6052_s23 + $0x8] sm:$0xff] }
 0x8c4   : > { %v5476_v55 = vpop.eup %5475  ;;  %5280 = vmatmul.mubr.msk.f32.vlgmr.msra.gmra.mrb[44].mxu0 %vm1630_vm3, %v3767_v41  ;;  %5283 = vmatpush3.msra.mxu1 %v3410_v40  ;;  %v5345_v39 = vpack.c.bf16 %v4510_v38, %v4509_v37  ;;  %v4511_v40 = vld [vmem:[%s6052_s23 + $0x10] sm:$0xff]  ;;  %v4512_v41 = vld [vmem:[%s6052_s23 + $0x18] sm:$0xff] }
 0x8c5   : > { %v3768_v18 = vmul.f32 %v5476_v55, %v5468_v10  ;;  %5284 = vmatprep.mubr.msk.f32.mxu1 %vm5719_vm2, %v5718_v32  ;;  %5288 = vmatpush3.msra.mxu0 %v6314_v4  ;;  %v5349_v55 = vpack.c.bf16 %v4512_v41, %v4511_v40 }
 0x8c6   : > { %5289 = vmatprep.mubr.msk.f32.mxu0 %vm5719_vm2, %v5718_v32  ;;  %5292 = vmatprep.subr.mxu1 %v5718_v32 }
 0x8c7   : > { %5285 = vmatmul.mubr.msk.f32.vlgmr.msra.gmra.mrb[40].mxu1 %vm1630_vm3, %v3768_v18  ;;  %5297 = vmatprep.subr.mxu0 %v5718_v32  ;;  %v4513_v18 = vld [vmem:[%s6052_s23 + $0x20] sm:$0xff] }
 0x8c8   : > { %5293 = vmatpush3.msra.mxu1 %v6329_v20  ;;  %5294 = vmatprep.mubr.msk.f32.mxu1 %vm5719_vm2, %v5718_v32 }
 0x8c9   : > { %5302 = vmatprep.subr.mxu1 %v5718_v32 }
 0x94f   : > { %v4383_v60 = vpop.xlane.xlu0 %4382 }
 0x950   : > { %v4387_v30 = vmul.f32 0.03125, %v4383_v60  ;;  %v4514_v60 = vld [vmem:[%s6052_s23 + $0x28] sm:$0xff] }
 0x952   : > { %v4389_v42 = vadd.f32 1e-12, %v4387_v30  ;;  %v5353_v30 = vpack.c.bf16 %v4514_v60, %v4513_v18 }
 0x954   : > { %5477 = vrsqrt.f32 %v4389_v42  ;;  %v4515_v42 = vld [vmem:[%s6052_s23 + $0x30] sm:$0xff] }
 0x95e   : > { %v5478_v4 = vpop.eup %5477 }
 0x95f   : > { %v4393_v22 = vmul.f32 %v5478_v4, %v4377_v6  ;;  %v4516_v4 = vld [vmem:[%s6052_s23 + $0x38] sm:$0xff] }
 0x961   : > { %v4399_v20 = vmul.f32 %v4398_v23, %v4393_v22  ;;  %v5357_v22 = vpack.c.bf16 %v4516_v4, %v4515_v42 }
 0x963   : > { %v6542_v51 = vadd.f32 %v4404_v47, %v4399_v20 }
 0x992   : > { %v3838_v25 = vpop.f32.mrb[42].mxu0 }
 0x993   : > { %v5271_v27 = vpop.f32.mrb[43].mxu0  ;;  %5290 = vmatmul.mubr.msk.f32.vlgmr.msra.gmra.mrb[46].mxu0 %vm1630_vm3, %v3838_v25 }
 0x994   : > { %5298 = vmatpush3.msra.mxu0 %v6334_v8  ;;  %5299 = vmatprep.mubr.msk.f32.mxu0 %vm5719_vm2, %v5718_v32 }
 0x995   : > { %5338 = vmatprep.subr.bf16.mxu0 %v5337_v16 }
 0x996   : > { %v3911_v28 = vpop.f32.mrb[38].mxu1 }
 0x997   : > { %v3984_v44 = vpop.f32.mrb[44].mxu0  ;;  %v5276_v45 = vpop.f32.mrb[39].mxu1  ;;  %5295 = vmatmul.mubr.msk.f32.vlgmr.msra.gmra.mrb[42].mxu1 %vm1630_vm3, %v3911_v28 }
 0x998   : > { %v5281_v46 = vpop.f32.mrb[45].mxu0  ;;  %5300 = vmatmul.mubr.msk.f32.vlgmr.msra.gmra.mrb[48].mxu0 %vm1630_vm3, %v3984_v44  ;;  %5303 = vmatpush3.msra.mxu1 %v6341_v12 }
 0x999   : > { %5315 = vmatprep.mubr.msk.f32.mxu0 %vm742_vm1, %v6542_v51  ;;  %5304 = vmatprep.mubr.msk.f32.mxu1 %vm5719_vm2, %v5718_v32 }
 0x99a   : > { %v4057_v8 = vpop.f32.mrb[40].mxu1  ;;  %5340 = vmatpush3.bf16.msra.mxu0 %v5337_v16  ;;  %5346 = vmatprep.subr.bf16.mxu1 %v5345_v39 }
 0x99b   : > { %v5286_v52 = vpop.f32.mrb[41].mxu1  ;;  %5305 = vmatmul.mubr.msk.f32.vlgmr.msra.gmra.mrb[44].mxu1 %vm1630_vm3, %v4057_v8 }
 0x99c   : > { %5348 = vmatpush3.bf16.msra.mxu1 %v5345_v39 }
 0x99d   : > { %5350 = vmatprep.subr.bf16.mxu1 %v5349_v55 }
 0x9a0   : > { %5352 = vmatpush3.bf16.msra.mxu1 %v5349_v55 }
 0x9a1   : > { %5354 = vmatprep.subr.bf16.mxu1 %v5353_v30 }
 0x9a4   : > { %5356 = vmatpush3.bf16.msra.mxu1 %v5353_v30 }
 0x9a5   : > { %5358 = vmatprep.subr.bf16.mxu1 %v5357_v22 }
 0x9a8   : > { %5360 = vmatpush3.bf16.msra.mxu1 %v5357_v22 }
 0xa66   : > { %v4130_v53 = vpop.f32.mrb[46].mxu0 }
 0xa67   : > { %v5291_v54 = vpop.f32.mrb[47].mxu0  ;;  %v4353_v57 = vsel %vm742_vm1, %v4130_v53, 0.0 }
 0xa6a   : > { %v4203_v56 = vpop.f32.mrb[42].mxu1 }
 0xa6b   : > { %v4354_v58 = vsel %vm742_vm1, %v4203_v56, 0.0  ;;  %v4276_v62 = vpop.f32.mrb[48].mxu0  ;;  %v5296_v63 = vpop.f32.mrb[43].mxu1 }
 0xa6c   : > { %v4355_v12 = vadd.f32 %v4354_v58, %v4353_v57  ;;  %v5301_v0 = vpop.f32.mrb[49].mxu0  ;;  %v4356_v3 = vsel %vm742_vm1, %v4276_v62, 0.0  ;;  %v4520_v58 = vrot.slane %v6493_v2, %v6484_v31 }
 0xa6e   : > { %v4357_v61 = vadd.f32 %v4356_v3, %v4355_v12  ;;  %v4349_v32 = vpop.f32.mrb[44].mxu1 }
 0xa6f   : > { %v4358_v5 = vsel %vm742_vm1, %v4349_v32, 0.0  ;;  %v5306_v9 = vpop.f32.mrb[45].mxu1 }
 0xa70   : > { %v4359_v1 = vadd.f32 %v4358_v5, %v4357_v61 }
 0xa72   : > { %v4365_v48 = vadd.f32 %v6497_v26, %v4359_v1  ;;  %v4409_v26 = vld [vmem:[%s6039_s5 + $0x10] sm:$0xff]  ;;  %s4653_s5 = sshll.u32 %s5720_s25, 4  ;;  %s4654_s5 = int_to_ptr.vmem [resolvable:$true] %s4653_s5 }
 0xa73   : > { %s5637_s4 = scalar_lea.vmem %s4654_s5, 256  ;;  %p5644_p6 = scmp.lt.s32.totalorder %s4654_s5, %s4654_s5 }
 0xa74   : > { %v4367_v7 = vadd.f32 %v4365_v48, %v6355_v19  ;;  %v5341_v19 = vpack.c.bf16 %v4410_v59, %v4409_v26  ;;  %v4633_v26 = vsub.s32 2, %v6279_v29  ;;  %v4639_v59 = vsub.s32 3, %v6279_v29  ;;  %p5638_p13 = scmp.ne.s32.totalorder %s4654_s5, %s5637_s4  ;;  %p5645_p1 = scmp.lt.s32.totalorder %s5637_s4, %s5637_s4 }
 0xa76   : > { %v4371_v11 = vsel %vm742_vm1, %v4367_v7, 0.0  ;;  %5342 = vmatprep.subr.bf16.mxu0 %v5341_v19  ;;  %p5639_p5 = pnand %p5638_p13, %p5399_p2  ;;  %p5646_p8 = por %p5645_p1, %p5644_p6 }
 0xa77   : > { %4372 = vadd.xlane.f32.xlu1 %v4371_v11  ;;  %5344 = vmatpush3.bf16.msra.mxu0 %v5341_v19  ;;  %v4634_v19 = vrot.slane %v6531_v43, %v4633_v26 }
 0xa78   : > { %p5640_p12 = pneg %p5639_p5 }
 0xa7a   : > { %p5647_p7 = pnand %p5646_p8, %p5640_p12 }
 0xb04   : > { %v4373_v49 = vpop.xlane.xlu1 %4372 }
 0xb05   : > { %v4376_v10 = vmul.f32 0.03125, %v4373_v49 }
 0xb07   : > { %v4378_v13 = vsub.f32 %v4367_v7, %v4376_v10 }
 0xb09   : > { %v4380_v14 = vmul.f32 %v4378_v13, %v4378_v13 }
 0xb0b   : > { %v4384_v15 = vsel %vm742_vm1, %v4380_v14, 0.0 }
 0xb0c   : > { %4385 = vadd.xlane.f32.xlu1 %v4384_v15 }
 0xb99   : > { %v4386_v17 = vpop.xlane.xlu1 %4385 }
 0xb9a   : > { %v4388_v21 = vmul.f32 0.03125, %v4386_v17 }
 0xb9c   : > { %v4390_v33 = vadd.f32 1e-12, %v4388_v21 }
 0xb9e   : > { %5479 = vrsqrt.f32 %v4390_v33 }
 0xba8   : > { %v5480_v6 = vpop.eup %5479 }
 0xba9   : > { %v4394_v34 = vmul.f32 %v5480_v6, %v4378_v13  ;;  %v4640_v6 = vrot.slane %v6531_v43, %v4639_v59 }
 0xbab   : > { %v4400_v35 = vmul.f32 %v4398_v23, %v4394_v34  ;;  %v4943_v23 = vld [vmem:[%s6687_s6] ss:$0 sm:$0xff] }
 0xbad   : > { %v4406_v36 = vadd.f32 %v4404_v47, %v4400_v35 }
 0xbaf   : > { %5316 = vmatmul.mubr.msk.f32.vlgmr.msra.gmra.mrb[50].mxu0 %vm742_vm1, %v4406_v36 }
 0xc82   : > { %v5317_v25 = vpop.f32.mrb[50].mxu0 }
 0xc83   : > { %v4496_v27 = vadd.f32 %v5317_v25, %v4943_v23  ;;  %v4490_v20 = vpop.f32.mrb[51].mxu0 }
 0xc84   : > { %v4491_v47 = vadd.f32 %v4943_v23, %v4490_v20 }
 0xc85   : > { %v4502_v28 = vmul.f32 0.70710677, %v4496_v27  ;;  %v4500_v54 = vmul.f32 0.5, %v4496_v27 }
 0xc86   : > { %v4501_v44 = vmul.f32 0.70710677, %v4491_v47  ;;  %v4499_v52 = vmul.f32 0.5, %v4491_v47 }
 0xc87   : > { %5481 = verf.f32 %v4502_v28 }
 0xc88   : > { %5483 = verf.f32 %v4501_v44 }
 0xc91   : > { %v5482_v45 = vpop.eup %5481 }
 0xc92   : > { %v5484_v46 = vpop.eup %5483  ;;  %v4506_v8 = vadd.f32 1.0, %v5482_v45 }
 0xc93   : > { %v4505_v53 = vadd.f32 1.0, %v5484_v46 }
 0xc94   : > { %v4508_v57 = vmul.f32 %v4506_v8, %v4500_v54 }
 0xc95   : > { %v4507_v56 = vmul.f32 %v4505_v53, %v4499_v52 }
 0xc97   : > { %5334 = vmatprep.mubr.msk.f32.mxu1 %vm4521_vm4, %v4507_v56 }
 0xc98   : > { %5335 = vmatmul.mubr.msk.f32.vlgmr.msra.gmra.mrb[46].mxu1 %vm4521_vm4, %v4508_v57 }
 0xd6b   : > { %v5336_v62 = vpop.f32.mrb[46].mxu1 }
 0xd6c   : > { %v4600_v63 = vadd.f32 %v5336_v62, %v4520_v58  ;;  %v4594_v12 = vpop.f32.mrb[47].mxu1 }
 0xd6d   : > { %v4595_v0 = vadd.f32 %v4594_v12, %v4520_v58 }
 0xd6e   : > { %v4604_v3 = vadd.f32 %v4600_v63, %v4406_v36 }
 0xd6f   : > { %v4603_v61 = vadd.f32 %v4595_v0, %v6542_v51 }
 0xd70   : > { %v4608_v32 = vsel %vm742_vm1, %v4604_v3, 0.0 }
 0xd71   : > { %4609 = vadd.xlane.f32.xlu1 %v4608_v32  ;;  %v4605_v5 = vsel %vm742_vm1, %v4603_v61, 0.0 }
 0xd72   : > { %4606 = vadd.xlane.f32.xlu0 %v4605_v5 }
 0xdfe   : > { %v4610_v9 = vpop.xlane.xlu1 %4609 }
 0xdff   : > { %v4612_v1 = vmul.f32 0.03125, %v4610_v9  ;;  %v4607_v48 = vpop.xlane.xlu0 %4606 }
 0xe00   : > { %v4611_v7 = vmul.f32 0.03125, %v4607_v48 }
 0xe01   : > { %v4614_v11 = vsub.f32 %v4604_v3, %v4612_v1 }
 0xe02   : > { %v4613_v49 = vsub.f32 %v4603_v61, %v4611_v7 }
 0xe03   : > { %v4616_v31 = vmul.f32 %v4614_v11, %v4614_v11 }
 0xe04   : > { %v4615_v2 = vmul.f32 %v4613_v49, %v4613_v49 }
 0xe05   : > { %v4620_v10 = vsel %vm742_vm1, %v4616_v31, 0.0 }
 0xe06   : > { %4621 = vadd.xlane.f32.xlu1 %v4620_v10  ;;  %v4617_v13 = vsel %vm742_vm1, %v4615_v2, 0.0 }
 0xe07   : > { %4618 = vadd.xlane.f32.xlu0 %v4617_v13 }
 0xe93   : > { %v4622_v51 = vpop.xlane.xlu1 %4621 }
 0xe94   : > { %v4624_v14 = vmul.f32 0.03125, %v4622_v51  ;;  %v4619_v15 = vpop.xlane.xlu0 %4618 }
 0xe95   : > { %v4623_v24 = vmul.f32 0.03125, %v4619_v15 }
 0xe96   : > { %v4626_v50 = vadd.f32 1e-12, %v4624_v14 }
 0xe97   : > { %v4625_v16 = vadd.f32 1e-12, %v4623_v24 }
 0xe98   : > { %5485 = vrsqrt.f32 %v4626_v50 }
 0xe99   : > { %5487 = vrsqrt.f32 %v4625_v16 }
 0xea2   : > { %v5486_v17 = vpop.eup %5485 }
 0xea3   : > { %v5488_v21 = vpop.eup %5487  ;;  %v4630_v33 = vmul.f32 %v5486_v17, %v4614_v11 }
 0xea4   : > { %v4629_v34 = vmul.f32 %v5488_v21, %v4613_v49 }
 0xea5   : > { %v4636_v35 = vmul.f32 %v4634_v19, %v4630_v33 }
 0xea6   : > { %v4635_v36 = vmul.f32 %v4634_v19, %v4629_v34 }
 0xea7   : > { %v4642_v37 = vadd.f32 %v4640_v6, %v4636_v35 }
 0xea8   : > { %v4641_v38 = vadd.f32 %v4640_v6, %v4635_v36 }
 0xea9   : > { %4644 = vst.msk [vmem:[#allocation2 + $0x8] sm:$0xff] %vm742_vm1, %v4642_v37  ;;  %4646 = vst.msk [vmem:[#allocation12 + $0x8] sm:$0xff] %vm742_vm1, %v4642_v37 }
 0xeaa   : > { %4643 = vst.msk [vmem:[#allocation2] sm:$0xff] %vm742_vm1, %v4641_v38  ;;  %4645 = vst.msk [vmem:[#allocation12] sm:$0xff] %vm742_vm1, %v4641_v38 }
 0xeab   : > { %5650 = shalt.err (!%p5647_p7)
}
 0xeac   : > { %s6688_s22 = sld [smem:[#allocation24_spill]] }
 0xeb2   : > { %s5651_s28 = scalar_lea.hbm %s6688_s22, 256 }
 0xeb3   : > { %p5652_p10 = scmp.ne.s32.totalorder %s6688_s22, %s5651_s28  ;;  %p5657_p11 = scmp.lt.u32.totalorder %s5651_s28, %s6688_s22 }
 0xeb5   : > { %p5653_p4 = pnand %p5652_p10, %p5399_p2 }
 0xeb7   : > { %p5654_p3 = pneg %p5653_p4 }
 0xeb9   : > { %p5659_p9 = pnand %p5657_p11, %p5654_p3 }
 0xebb   : > { %5662 = shalt.err (!%p5659_p9)
}
 0xebc   : > { %s5721_s15 = smov 128   ;;  %s5722_s26 = smov 8  }
 0xebd   : > { %5376 = dma.vmem_to_hbm [thread:$0]  (%p5399_p2), %s4654_s5, 256, %s6688_s22, [#allocation5], %s5721_s15, %s5721_s15, %s5722_s26  }
 0xebe   : > { %5692 = dma.done.wait (%p5399_p2), [#allocation5], 256  }
 0xebf   : > { %5694 = vsyncadd (%p5399_p2), [#allocation5], 4294967040 }
 0xec0 PF: > { %s6689_s20 = sld [smem:[#allocation18_spill]]  ;;  %s6690_s16 = sld [smem:[#allocation17_spill]] }
 0xec1   : > { %s6691_s19 = sld [smem:[#allocation19_spill]]  ;;  %s6692_s17 = smov %s5701_s18 }
 0xec6   : > { %p26_p0 = scmp.ge.s32.totalorder %s6689_s20, 4   ;;  %s6693_s18 = smov %s6690_s16 }
 0xec8   :  { %28 = sbr.rel (!%p26_p0) target bundleno = 13 (0xd), region = 157 }
 0xecf   :  { %4669 = vsyncpa [#allocation4], 1 }
 0xed0   :  { %4671 = vsyncpa [#allocation4 + $0x1], 1 }
 0xed1   :  { %4672 = vsyncpa [#allocation7], 1 }
 0xed2   :  { %4674 = vsyncpa [#allocation7 + $0x1], 1 }
 0xed3   :  { %4675 = vsyncpa [#allocation10], 1 }
 0xed4   :  { %4677 = vsyncpa [#allocation10 + $0x1], 1 }
 0xed5   :  { %4678 = vsyncpa [#allocation5], 1 }
 0xed6   :  { %4680 = vsyncpa [#allocation5 + $0x1], 1 }

</bundles_post_ra>
